<compile_context>
chip_gen: v7x
topology: tpu7x:2x2x1
jax: 0.10.0
libtpu: 0.0.40
codegen_flags: <defaults>
</compile_context>

<pallas_src>
import jax
import jax.numpy as jnp
import numpy as np
from jax.experimental import pallas as pl
from jax.experimental.pallas import tpu as pltpu

NC = 7
LAMBDA_BOX = 0.05
LAMBDA_OBJ = 1.0
LAMBDA_CLS = 0.5
LAMBDA_SMALL = 2.0

_LANES = 128
_MAX_TILE_ROWS = 1024          # (1024, 128) f32 = 512 KiB per pipeline buffer
_PAD_LOGIT = -1e9              # softplus(-1e9) == 0 exactly in f32


def _round_up(x, m):
    return (x + m - 1) // m * m


# ---------------------------------------------------------------------------
# Fused per-level kernel:
#   step 0              : per-target box decode + IoU + CE + small-obj weights
#                         + objectness correction term (lane-packed into scratch)
#   every step          : sum(softplus(obj_logits)) over one (tile_rows, 128) tile
#   last step           : pack everything into one lane-dense (1, 128) output
# ---------------------------------------------------------------------------
def _make_level_kernel(nc, lanes):
    def kernel(ps_ref, tgt_ref, obj_ref, out_ref, stat_ref, acc_ref):
        step = pl.program_id(0)

        @pl.when(step == 0)
        def _():
            acc_ref[...] = jnp.zeros_like(acc_ref)

            ps = ps_ref[...]          # (NT, 5+NC) gathered predictions
            tgt = tgt_ref[...]        # (NT, 6)    targets [x, y, w, h, unused, cls]

            # _decode_boxes: sigmoid on xy, exp on wh
            xy = jax.nn.sigmoid(ps[:, 0:2])
            wh = jnp.exp(ps[:, 2:4])
            b1x, b1y = xy[:, 0:1], xy[:, 1:2]
            b1w, b1h = wh[:, 0:1], wh[:, 1:2]
            b2x, b2y = tgt[:, 0:1], tgt[:, 1:2]
            b2w, b2h = tgt[:, 2:3], tgt[:, 3:4]

            # _box_iou (element-wise, center-size boxes)
            b1x1, b1y1 = b1x - b1w * 0.5, b1y - b1h * 0.5
            b1x2, b1y2 = b1x + b1w * 0.5, b1y + b1h * 0.5
            b2x1, b2y1 = b2x - b2w * 0.5, b2y - b2h * 0.5
            b2x2, b2y2 = b2x + b2w * 0.5, b2y + b2h * 0.5

            iw = jnp.maximum(jnp.minimum(b1x2, b2x2) - jnp.maximum(b1x1, b2x1), 0.0)
            ih = jnp.maximum(jnp.minimum(b1y2, b2y2) - jnp.maximum(b1y1, b2y1), 0.0)
            inter = iw * ih
            w1, h1 = b1x2 - b1x1, b1y2 - b1y1
            w2, h2 = b2x2 - b2x1, b2y2 - b2y1
            union = w1 * h1 + 1e-16 + w2 * h2 - inter
            iou = inter / union                                   # (NT, 1)

            liou_mean = jnp.mean(1.0 - iou)

            # small-object weights: mean exp(-w*h*lambda_small)
            area = tgt[:, 2:3] * tgt[:, 3:4]
            sw_mean = jnp.mean(jnp.exp(-area * LAMBDA_SMALL))

            # objectness correction: sum over matched cells of logit * clamp(iou, 0)
            # TODO(synk): if two targets map to the same (b,a,gj,gi) cell this sums
            # their contributions, whereas the reference scatter is last-write-wins.
            obj_corr = jnp.sum(ps[:, 4:5] * jnp.maximum(iou, 0.0))

            # cross-entropy over class logits ps[:, 5:] vs labels = targets[:, 5]
            logits = ps[:, 5:5 + nc]                              # (NT, NC)
            labels = tgt[:, 5:6].astype(jnp.int32)                # (NT, 1)
            cols = jax.lax.broadcasted_iota(jnp.int32, logits.shape, 1)
            picked = jnp.sum(jnp.where(cols == labels, logits, 0.0),
                             axis=1, keepdims=True)
            mx = jnp.max(logits, axis=1, keepdims=True)
            lse = mx + jnp.log(jnp.sum(jnp.exp(logits - mx), axis=1, keepdims=True))
            ce = jnp.mean(lse - picked)

            # pack scalars lane-dense: [liou, sw, ce, obj_corr, <filled later>, 0...]
            lane = jax.lax.broadcasted_iota(jnp.int32, (1, lanes), 1)
            packed = jnp.where(lane == 0, liou_mean, 0.0)
            packed = jnp.where(lane == 1, sw_mean, packed)
            packed = jnp.where(lane == 2, ce, packed)
            packed = jnp.where(lane == 3, obj_corr, packed)
            stat_ref[...] = packed

        # ---- tiled, pipelined softplus partial-sum over the objectness map ----
        x = obj_ref[...]                                          # (tile_rows, 128)
        sp = jnp.maximum(x, 0.0) + jnp.log1p(jnp.exp(-jnp.abs(x)))
        acc_ref[...] = acc_ref[...] + jnp.sum(sp, axis=0, keepdims=True)

        @pl.when(step == pl.num_programs(0) - 1)
        def _():
            lane = jax.lax.broadcasted_iota(jnp.int32, (1, lanes), 1)
            total_sp = jnp.sum(acc_ref[...])
            out_ref[...] = jnp.where(lane == 4, total_sp, stat_ref[...])

    return kernel


def level_stats(ps, tgt, obj_flat):
    """Fused per-level Pallas call.

    Returns (mean(1-iou), mean(small_weights), cross_entropy, lobj) for one level,
    where lobj = mean BCEWithLogits(obj_logits, tobj) computed scatter-free.
    """
    nt, c = ps.shape
    total = obj_flat.shape[0]

    rows = -(-total // _LANES)
    tile_rows = min(_MAX_TILE_ROWS, _round_up(rows, 8))
    rows_padded = _round_up(rows, tile_rows)
    pad = rows_padded * _LANES - total
    obj2d = jnp.pad(obj_flat, (0, pad),
                    constant_values=_PAD_LOGIT).reshape(rows_padded, _LANES)
    num_blocks = rows_padded // tile_rows

    out = pl.pallas_call(
        _make_level_kernel(NC, _LANES),
        out_shape=jax.ShapeDtypeStruct((1, _LANES), jnp.float32),
        grid_spec=pltpu.PrefetchScalarGridSpec(
            num_scalar_prefetch=0,
            grid=(num_blocks,),
            in_specs=[
                pl.BlockSpec((nt, c), lambda i: (0, 0)),            # ps (resident)
                pl.BlockSpec(tgt.shape, lambda i: (0, 0)),          # targets (resident)
                pl.BlockSpec((tile_rows, _LANES), lambda i: (i, 0)),  # obj map tiles
            ],
            out_specs=pl.BlockSpec((1, _LANES), lambda i: (0, 0)),
            scratch_shapes=[
                pltpu.VMEM((1, _LANES), jnp.float32),   # packed per-target stats
                pltpu.VMEM((1, _LANES), jnp.float32),   # softplus lane accumulator
            ],
        ),
        compiler_params=pltpu.CompilerParams(
            dimension_semantics=("arbitrary",),          # reduction axis
            vmem_limit_bytes=32 * 1024 * 1024,
        ),
    )(ps, tgt, obj2d)

    liou_mean = out[0, 0]
    sw_mean = out[0, 1]
    ce = out[0, 2]
    obj_corr = out[0, 3]
    sp_sum = out[0, 4]
    lobj = (sp_sum - obj_corr) / jnp.float32(total)
    return liou_mean, sw_mean, ce, lobj


# ---------------------------------------------------------------------------
# Glue: SmartCashLoss forward (jitted, no host syncs)
# ---------------------------------------------------------------------------
# TODO(synk): the reference `_build_targets` returns (bs, na, gain, off) — an int,
# an int, a ones(7) tensor and a (5,2) offset tensor — so `n = b.shape[0]` in the
# original forward would raise; we implement the evident intent: one
# (batch, anchor, grid_j, grid_i) index per target, built deterministically here.
def build_target_indices(nt, bsz, na, h, w):
    idx = jnp.arange(nt)
    b = idx % bsz
    a = idx % na
    gj = (idx * 3) % h
    gi = (idx * 5) % w
    return b, a, gj, gi


@jax.jit
def smart_cash_loss(preds, targets, index_lists):
    lbox = jnp.float32(0.0)
    lobj = jnp.float32(0.0)
    lcls = jnp.float32(0.0)
    for pi, pred in enumerate(preds):
        b, a, gj, gi = index_lists[pi]
        n = b.shape[0]
        if n:
            ps = pred[b, a, gj, gi]                  # (NT, 5+NC) gathered predictions
            obj_flat = pred[..., 4].reshape(-1)      # full objectness map, flat
            liou_m, sw_m, ce, lobj_lvl = level_stats(ps, targets, obj_flat)

            # matches reference: lbox += (1-iou).mean();  lbox *= small_weights.mean()
            lbox = (lbox + liou_m) * sw_m
            lobj = lobj + lobj_lvl
            lcls = lcls + ce

    loss = LAMBDA_BOX * lbox + LAMBDA_OBJ * lobj + LAMBDA_CLS * lcls
    # return device scalars (no float() host sync; keeps jit/grad usable)
    return loss, {"box": lbox, "obj": lobj, "cls": lcls}


# ---------------------------------------------------------------------------
# Pure-JAX reference (for correctness check only)
# ---------------------------------------------------------------------------
def _ref_loss(preds, targets, index_lists):
    lbox = jnp.float32(0.0)
    lobj = jnp.float32(0.0)
    lcls = jnp.float32(0.0)
    for pi, pred in enumerate(preds):
        b, a, gj, gi = index_lists[pi]
        ps = pred[b, a, gj, gi]
        xy = jax.nn.sigmoid(ps[:, 0:2])
        wh = jnp.exp(ps[:, 2:4])
        b1x1, b1y1 = xy[:, 0] - wh[:, 0] / 2, xy[:, 1] - wh[:, 1] / 2
        b1x2, b1y2 = xy[:, 0] + wh[:, 0] / 2, xy[:, 1] + wh[:, 1] / 2
        b2x1, b2y1 = targets[:, 0] - targets[:, 2] / 2, targets[:, 1] - targets[:, 3] / 2
        b2x2, b2y2 = targets[:, 0] + targets[:, 2] / 2, targets[:, 1] + targets[:, 3] / 2
        inter = (jnp.clip(jnp.minimum(b1x2, b2x2) - jnp.maximum(b1x1, b2x1), 0)
                 * jnp.clip(jnp.minimum(b1y2, b2y2) - jnp.maximum(b1y1, b2y1), 0))
        union = (b1x2 - b1x1) * (b1y2 - b1y1) + 1e-16 + (b2x2 - b2x1) * (b2y2 - b2y1) - inter
        iou = inter / union
        lbox = (lbox + jnp.mean(1.0 - iou)) * jnp.mean(
            jnp.exp(-targets[:, 2] * targets[:, 3] * LAMBDA_SMALL))
        tobj = jnp.zeros(pred.shape[:-1], jnp.float32).at[b, a, gj, gi].set(
            jnp.maximum(iou, 0.0))
        x = pred[..., 4]
        lobj = lobj + jnp.mean(jnp.maximum(x, 0.0) - x * tobj
                               + jnp.log1p(jnp.exp(-jnp.abs(x))))
        logits = ps[:, 5:]
        labels = targets[:, 5].astype(jnp.int32)
        lse = jax.scipy.special.logsumexp(logits, axis=1)
        picked = jnp.take_along_axis(logits, labels[:, None], axis=1)[:, 0]
        lcls = lcls + jnp.mean(lse - picked)
    return LAMBDA_BOX * lbox + LAMBDA_OBJ * lobj + LAMBDA_CLS * lcls


if __name__ == "__main__":
    key = jax.random.PRNGKey(0)
    B, A, NT = 2, 3, 8
    # two pyramid levels; channel-last layout (B, A, H, W, 5+NC)
    shapes = [(B, A, 16, 16, 5 + NC), (B, A, 8, 8, 5 + NC)]

    k_preds, k_box, k_cls = jax.random.split(key, 3)
    pred_keys = jax.random.split(k_preds, len(shapes))
    preds = [jax.random.normal(k, s, jnp.float32) for k, s in zip(pred_keys, shapes)]

    # targets: (NT, 6) = [x, y, w, h, unused, cls]
    boxes = jax.random.uniform(k_box, (NT, 4), jnp.float32, 0.1, 0.9)
    cls = jax.random.randint(k_cls, (NT,), 0, NC).astype(jnp.float32)
    targets = jnp.concatenate(
        [boxes, jnp.zeros((NT, 1), jnp.float32), cls[:, None]], axis=1)

    index_lists = [build_target_indices(NT, B, A, s[2], s[3]) for s in shapes]

    loss, parts = smart_cash_loss(preds, targets, index_lists)
    jax.block_until_ready(loss)

    ref = _ref_loss(preds, targets, index_lists)
    np.testing.assert_allclose(np.asarray(loss), np.asarray(ref),
                               rtol=2e-3, atol=1e-4)
    print("KERNEL_OK")
</pallas_src>

<mosaic_0001>
module attributes {stable_mosaic.version = 11 : i64} {
  func.func @kernel(%arg0: i32, %arg1: memref<8x12xf32, #tpu.memory_space<vmem>>, %arg2: memref<8x6xf32, #tpu.memory_space<vmem>>, %arg3: memref<16x128xf32, #tpu.memory_space<vmem>>, %arg4: memref<1x128xf32, #tpu.memory_space<vmem>>, %arg5: memref<1x128xf32, #tpu.memory_space<vmem>>, %arg6: memref<1x128xf32, #tpu.memory_space<vmem>>) attributes {dimension_semantics = [#tpu.dimension_semantics<arbitrary>], iteration_bounds = array<i64: 1>, scalar_prefetch = 0 : i64, scratch_operands = 2 : i64, tpu.core_type = #tpu.core_type<tc>, window_params = [{pipeline_mode = #tpu.pipeline_mode<synchronous>, transform_indices = @transform_0, window_bounds = array<i64: 8, 12>}, {pipeline_mode = #tpu.pipeline_mode<synchronous>, transform_indices = @transform_1, window_bounds = array<i64: 8, 6>}, {transform_indices = @transform_2, window_bounds = array<i64: 16, 128>}, {pipeline_mode = #tpu.pipeline_mode<synchronous>, transform_indices = @transform_3, window_bounds = array<i64: 1, 128>}]} {
    %c0_i32 = arith.constant 0 : i32
    %0 = arith.cmpi eq, %arg0, %c0_i32 : i32
    %1 = arith.extui %0 : i1 to i32
    %c0_i32_0 = arith.constant 0 : i32
    %2 = arith.cmpi ne, %1, %c0_i32_0 : i32
    scf.if %2 {
      %cst_10 = arith.constant 0.000000e+00 : f32
      %20 = vector.broadcast %cst_10 : f32 to vector<1x128xf32>
      %c0_11 = arith.constant 0 : index
      %c0_12 = arith.constant 0 : index
      %21 = vector.load %arg6[%c0_11, %c0_12] : memref<1x128xf32, #tpu.memory_space<vmem>>, vector<1x128xf32>
      tpu.vector_store %arg6[%c0_11, %c0_12], %20 {strides = array<i32>} : memref<1x128xf32, #tpu.memory_space<vmem>>, vector<1x128xf32>,
      %c0_13 = arith.constant 0 : index
      %c0_14 = arith.constant 0 : index
      %22 = vector.load %arg1[%c0_13, %c0_14] : memref<8x12xf32, #tpu.memory_space<vmem>>, vector<8x12xf32>
      %c0_15 = arith.constant 0 : index
      %c0_16 = arith.constant 0 : index
      %23 = vector.load %arg2[%c0_15, %c0_16] : memref<8x6xf32, #tpu.memory_space<vmem>>, vector<8x6xf32>
      %24 = vector.extract_strided_slice %22 {offsets = [0, 0], sizes = [8, 2], strides = [1, 1]} : vector<8x12xf32> to vector<8x2xf32>
      %25 = arith.negf %24 : vector<8x2xf32>
      %26 = math.exp %25 : vector<8x2xf32>
      %cst_17 = arith.constant 1.000000e+00 : f32
      %27 = vector.broadcast %cst_17 : f32 to vector<8x2xf32>
      %28 = arith.addf %27, %26 : vector<8x2xf32>
      %29 = arith.divf %27, %28 : vector<8x2xf32>
      %30 = vector.extract_strided_slice %22 {offsets = [0, 2], sizes = [8, 2], strides = [1, 1]} : vector<8x12xf32> to vector<8x2xf32>
      %31 = math.exp %30 : vector<8x2xf32>
      %32 = vector.extract_strided_slice %29 {offsets = [0, 0], sizes = [8, 1], strides = [1, 1]} : vector<8x2xf32> to vector<8x1xf32>
      %33 = vector.extract_strided_slice %29 {offsets = [0, 1], sizes = [8, 1], strides = [1, 1]} : vector<8x2xf32> to vector<8x1xf32>
      %34 = vector.extract_strided_slice %31 {offsets = [0, 0], sizes = [8, 1], strides = [1, 1]} : vector<8x2xf32> to vector<8x1xf32>
      %35 = vector.extract_strided_slice %31 {offsets = [0, 1], sizes = [8, 1], strides = [1, 1]} : vector<8x2xf32> to vector<8x1xf32>
      %36 = vector.extract_strided_slice %23 {offsets = [0, 0], sizes = [8, 1], strides = [1, 1]} : vector<8x6xf32> to vector<8x1xf32>
      %37 = vector.extract_strided_slice %23 {offsets = [0, 1], sizes = [8, 1], strides = [1, 1]} : vector<8x6xf32> to vector<8x1xf32>
      %38 = vector.extract_strided_slice %23 {offsets = [0, 2], sizes = [8, 1], strides = [1, 1]} : vector<8x6xf32> to vector<8x1xf32>
      %39 = vector.extract_strided_slice %23 {offsets = [0, 3], sizes = [8, 1], strides = [1, 1]} : vector<8x6xf32> to vector<8x1xf32>
      %cst_18 = arith.constant 5.000000e-01 : f32
      %40 = vector.broadcast %cst_18 : f32 to vector<8x1xf32>
      %41 = arith.mulf %34, %40 : vector<8x1xf32>
      %42 = arith.subf %32, %41 : vector<8x1xf32>
      %cst_19 = arith.constant 5.000000e-01 : f32
      %43 = vector.broadcast %cst_19 : f32 to vector<8x1xf32>
      %44 = arith.mulf %35, %43 : vector<8x1xf32>
      %45 = arith.subf %33, %44 : vector<8x1xf32>
      %cst_20 = arith.constant 5.000000e-01 : f32
      %46 = vector.broadcast %cst_20 : f32 to vector<8x1xf32>
      %47 = arith.mulf %34, %46 : vector<8x1xf32>
      %48 = arith.addf %32, %47 : vector<8x1xf32>
      %cst_21 = arith.constant 5.000000e-01 : f32
      %49 = vector.broadcast %cst_21 : f32 to vector<8x1xf32>
      %50 = arith.mulf %35, %49 : vector<8x1xf32>
      %51 = arith.addf %33, %50 : vector<8x1xf32>
      %cst_22 = arith.constant 5.000000e-01 : f32
      %52 = vector.broadcast %cst_22 : f32 to vector<8x1xf32>
      %53 = arith.mulf %38, %52 : vector<8x1xf32>
      %54 = arith.subf %36, %53 : vector<8x1xf32>
      %cst_23 = arith.constant 5.000000e-01 : f32
      %55 = vector.broadcast %cst_23 : f32 to vector<8x1xf32>
      %56 = arith.mulf %39, %55 : vector<8x1xf32>
      %57 = arith.subf %37, %56 : vector<8x1xf32>
      %cst_24 = arith.constant 5.000000e-01 : f32
      %58 = vector.broadcast %cst_24 : f32 to vector<8x1xf32>
      %59 = arith.mulf %38, %58 : vector<8x1xf32>
      %60 = arith.addf %36, %59 : vector<8x1xf32>
      %cst_25 = arith.constant 5.000000e-01 : f32
      %61 = vector.broadcast %cst_25 : f32 to vector<8x1xf32>
      %62 = arith.mulf %39, %61 : vector<8x1xf32>
      %63 = arith.addf %37, %62 : vector<8x1xf32>
      %64 = arith.minimumf %48, %60 : vector<8x1xf32>
      %65 = arith.maximumf %42, %54 : vector<8x1xf32>
      %66 = arith.subf %64, %65 : vector<8x1xf32>
      %cst_26 = arith.constant 0.000000e+00 : f32
      %67 = vector.broadcast %cst_26 : f32 to vector<8x1xf32>
      %68 = arith.maximumf %66, %67 : vector<8x1xf32>
      %69 = arith.minimumf %51, %63 : vector<8x1xf32>
      %70 = arith.maximumf %45, %57 : vector<8x1xf32>
      %71 = arith.subf %69, %70 : vector<8x1xf32>
      %cst_27 = arith.constant 0.000000e+00 : f32
      %72 = vector.broadcast %cst_27 : f32 to vector<8x1xf32>
      %73 = arith.maximumf %71, %72 : vector<8x1xf32>
      %74 = arith.mulf %68, %73 : vector<8x1xf32>
      %75 = arith.subf %48, %42 : vector<8x1xf32>
      %76 = arith.subf %51, %45 : vector<8x1xf32>
      %77 = arith.subf %60, %54 : vector<8x1xf32>
      %78 = arith.subf %63, %57 : vector<8x1xf32>
      %79 = arith.mulf %75, %76 : vector<8x1xf32>
      %cst_28 = arith.constant 1.000000e-16 : f32
      %80 = vector.broadcast %cst_28 : f32 to vector<8x1xf32>
      %81 = arith.addf %79, %80 : vector<8x1xf32>
      %82 = arith.mulf %77, %78 : vector<8x1xf32>
      %83 = arith.addf %81, %82 : vector<8x1xf32>
      %84 = arith.subf %83, %74 : vector<8x1xf32>
      %85 = arith.divf %74, %84 : vector<8x1xf32>
      %cst_29 = arith.constant 1.000000e+00 : f32
      %86 = vector.broadcast %cst_29 : f32 to vector<8x1xf32>
      %87 = arith.subf %86, %85 : vector<8x1xf32>
      %88 = vector.shape_cast %87 : vector<8x1xf32> to vector<1x8x1xf32>
      %cst_30 = arith.constant dense<0.000000e+00> : vector<1xf32>
      %89 = vector.multi_reduction <add>, %88, %cst_30 [1, 2] : vector<1x8x1xf32> to vector<1xf32>
      %90 = vector.shape_cast %89 : vector<1xf32> to vector<1x1x1xf32>
      %91 = vector.extract %90[0, 0, 0] : f32 from vector<1x1x1xf32>
      %cst_31 = arith.constant 8.000000e+00 : f32
      %92 = arith.divf %91, %cst_31 : f32
      %93 = vector.extract_strided_slice %23 {offsets = [0, 2], sizes = [8, 1], strides = [1, 1]} : vector<8x6xf32> to vector<8x1xf32>
      %94 = vector.extract_strided_slice %23 {offsets = [0, 3], sizes = [8, 1], strides = [1, 1]} : vector<8x6xf32> to vector<8x1xf32>
      %95 = arith.mulf %93, %94 : vector<8x1xf32>
      %cst_32 = arith.constant 0.000000e+00 : f32
      %96 = vector.broadcast %cst_32 : f32 to vector<8x1xf32>
      %97 = arith.subf %96, %95 : vector<8x1xf32>
      %cst_33 = arith.constant 2.000000e+00 : f32
      %98 = vector.broadcast %cst_33 : f32 to vector<8x1xf32>
      %99 = arith.mulf %97, %98 : vector<8x1xf32>
      %100 = math.exp %99 : vector<8x1xf32>
      %101 = vector.shape_cast %100 : vector<8x1xf32> to vector<1x8x1xf32>
      %cst_34 = arith.constant dense<0.000000e+00> : vector<1xf32>
      %102 = vector.multi_reduction <add>, %101, %cst_34 [1, 2] : vector<1x8x1xf32> to vector<1xf32>
      %103 = vector.shape_cast %102 : vector<1xf32> to vector<1x1x1xf32>
      %104 = vector.extract %103[0, 0, 0] : f32 from vector<1x1x1xf32>
      %cst_35 = arith.constant 8.000000e+00 : f32
      %105 = arith.divf %104, %cst_35 : f32
      %106 = vector.extract_strided_slice %22 {offsets = [0, 4], sizes = [8, 1], strides = [1, 1]} : vector<8x12xf32> to vector<8x1xf32>
      %cst_36 = arith.constant 0.000000e+00 : f32
      %107 = vector.broadcast %cst_36 : f32 to vector<8x1xf32>
      %108 = arith.maximumf %85, %107 : vector<8x1xf32>
      %109 = arith.mulf %106, %108 : vector<8x1xf32>
      %110 = vector.shape_cast %109 : vector<8x1xf32> to vector<1x8x1xf32>
      %cst_37 = arith.constant dense<0.000000e+00> : vector<1xf32>
      %111 = vector.multi_reduction <add>, %110, %cst_37 [1, 2] : vector<1x8x1xf32> to vector<1xf32>
      %112 = vector.shape_cast %111 : vector<1xf32> to vector<1x1x1xf32>
      %113 = vector.extract %112[0, 0, 0] : f32 from vector<1x1x1xf32>
      %114 = vector.extract_strided_slice %22 {offsets = [0, 5], sizes = [8, 7], strides = [1, 1]} : vector<8x12xf32> to vector<8x7xf32>
      %115 = vector.extract_strided_slice %23 {offsets = [0, 5], sizes = [8, 1], strides = [1, 1]} : vector<8x6xf32> to vector<8x1xf32>
      %116 = arith.fptosi %115 : vector<8x1xf32> to vector<8x1xi32>
      %117 = tpu.iota {dimensions = array<i32: 1>} : vector<8x7xi32>
      %118 = vector.broadcast %116 : vector<8x1xi32> to vector<8x7xi32>
      %119 = arith.cmpi eq, %117, %118 : vector<8x7xi32>
      %cst_38 = arith.constant 0.000000e+00 : f32
      %120 = vector.broadcast %cst_38 : f32 to vector<8x7xf32>
      %121 = arith.select %119, %114, %120 : vector<8x7xi1>, vector<8x7xf32>
      %cst_39 = arith.constant dense<0.000000e+00> : vector<8xf32>
      %122 = vector.multi_reduction <add>, %121, %cst_39 [1] : vector<8x7xf32> to vector<8xf32>
      %123 = vector.shape_cast %122 : vector<8xf32> to vector<8x1xf32>
      %cst_40 = arith.constant dense<0xFF800000> : vector<8xf32>
      %124 = vector.multi_reduction <maximumf>, %114, %cst_40 [1] : vector<8x7xf32> to vector<8xf32>
      %125 = vector.shape_cast %124 : vector<8xf32> to vector<8x1xf32>
      %126 = vector.broadcast %125 : vector<8x1xf32> to vector<8x7xf32>
      %127 = arith.subf %114, %126 : vector<8x7xf32>
      %128 = math.exp %127 : vector<8x7xf32>
      %cst_41 = arith.constant dense<0.000000e+00> : vector<8xf32>
      %129 = vector.multi_reduction <add>, %128, %cst_41 [1] : vector<8x7xf32> to vector<8xf32>
      %130 = vector.shape_cast %129 : vector<8xf32> to vector<8x1xf32>
      %131 = math.log %130 : vector<8x1xf32>
      %132 = arith.addf %125, %131 : vector<8x1xf32>
      %133 = arith.subf %132, %123 : vector<8x1xf32>
      %134 = vector.shape_cast %133 : vector<8x1xf32> to vector<1x8x1xf32>
      %cst_42 = arith.constant dense<0.000000e+00> : vector<1xf32>
      %135 = vector.multi_reduction <add>, %134, %cst_42 [1, 2] : vector<1x8x1xf32> to vector<1xf32>
      %136 = vector.shape_cast %135 : vector<1xf32> to vector<1x1x1xf32>
      %137 = vector.extract %136[0, 0, 0] : f32 from vector<1x1x1xf32>
      %cst_43 = arith.constant 8.000000e+00 : f32
      %138 = arith.divf %137, %cst_43 : f32
      %139 = tpu.iota {dimensions = array<i32: 1>} : vector<1x128xi32>
      %c0_i32_44 = arith.constant 0 : i32
      %140 = vector.broadcast %c0_i32_44 : i32 to vector<1x128xi32>
      %141 = arith.cmpi eq, %139, %140 : vector<1x128xi32>
      %cst_45 = arith.constant 0.000000e+00 : f32
      %142 = vector.broadcast %92 : f32 to vector<1x128xf32>
      %143 = vector.broadcast %cst_45 : f32 to vector<1x128xf32>
      %144 = arith.select %141, %142, %143 : vector<1x128xi1>, vector<1x128xf32>
      %c1_i32 = arith.constant 1 : i32
      %145 = vector.broadcast %c1_i32 : i32 to vector<1x128xi32>
      %146 = arith.cmpi eq, %139, %145 : vector<1x128xi32>
      %147 = vector.broadcast %105 : f32 to vector<1x128xf32>
      %148 = arith.select %146, %147, %144 : vector<1x128xi1>, vector<1x128xf32>
      %c2_i32 = arith.constant 2 : i32
      %149 = vector.broadcast %c2_i32 : i32 to vector<1x128xi32>
      %150 = arith.cmpi eq, %139, %149 : vector<1x128xi32>
      %151 = vector.broadcast %138 : f32 to vector<1x128xf32>
      %152 = arith.select %150, %151, %148 : vector<1x128xi1>, vector<1x128xf32>
      %c3_i32 = arith.constant 3 : i32
      %153 = vector.broadcast %c3_i32 : i32 to vector<1x128xi32>
      %154 = arith.cmpi eq, %139, %153 : vector<1x128xi32>
      %155 = vector.broadcast %113 : f32 to vector<1x128xf32>
      %156 = arith.select %154, %155, %152 : vector<1x128xi1>, vector<1x128xf32>
      %c0_46 = arith.constant 0 : index
      %c0_47 = arith.constant 0 : index
      %157 = vector.load %arg5[%c0_46, %c0_47] : memref<1x128xf32, #tpu.memory_space<vmem>>, vector<1x128xf32>
      tpu.vector_store %arg5[%c0_46, %c0_47], %156 {strides = array<i32>} : memref<1x128xf32, #tpu.memory_space<vmem>>, vector<1x128xf32>,
    } else {
    }
    %c0 = arith.constant 0 : index
    %c0_1 = arith.constant 0 : index
    %3 = vector.load %arg3[%c0, %c0_1] : memref<16x128xf32, #tpu.memory_space<vmem>>, vector<16x128xf32>
    %cst = arith.constant 0.000000e+00 : f32
    %4 = vector.broadcast %cst : f32 to vector<16x128xf32>
    %5 = arith.maximumf %3, %4 : vector<16x128xf32>
    %6 = math.absf %3 : vector<16x128xf32>
    %cst_2 = arith.constant 0.000000e+00 : f32
    %7 = vector.broadcast %cst_2 : f32 to vector<16x128xf32>
    %8 = arith.subf %7, %6 : vector<16x128xf32>
    %9 = math.exp %8 : vector<16x128xf32>
    %10 = math.log1p %9 : vector<16x128xf32>
    %11 = arith.addf %5, %10 : vector<16x128xf32>
    %c0_3 = arith.constant 0 : index
    %c0_4 = arith.constant 0 : index
    %12 = vector.load %arg6[%c0_3, %c0_4] : memref<1x128xf32, #tpu.memory_space<vmem>>, vector<1x128xf32>
    %cst_5 = arith.constant dense<0.000000e+00> : vector<128xf32>
    %13 = vector.multi_reduction <add>, %11, %cst_5 [0] : vector<16x128xf32> to vector<128xf32>
    %14 = vector.shape_cast %13 : vector<128xf32> to vector<1x128xf32>
    %15 = arith.addf %12, %14 : vector<1x128xf32>
    %c0_6 = arith.constant 0 : index
    %c0_7 = arith.constant 0 : index
    %16 = vector.load %arg6[%c0_6, %c0_7] : memref<1x128xf32, #tpu.memory_space<vmem>>, vector<1x128xf32>
    tpu.vector_store %arg6[%c0_6, %c0_7], %15 {strides = array<i32>} : memref<1x128xf32, #tpu.memory_space<vmem>>, vector<1x128xf32>,
    %c0_i32_8 = arith.constant 0 : i32
    %17 = arith.cmpi eq, %arg0, %c0_i32_8 : i32
    %18 = arith.extui %17 : i1 to i32
    %c0_i32_9 = arith.constant 0 : i32
    %19 = arith.cmpi ne, %18, %c0_i32_9 : i32
    scf.if %19 {
      %20 = tpu.iota {dimensions = array<i32: 1>} : vector<1x128xi32>
      %c0_10 = arith.constant 0 : index
      %c0_11 = arith.constant 0 : index
      %21 = vector.load %arg6[%c0_10, %c0_11] : memref<1x128xf32, #tpu.memory_space<vmem>>, vector<1x128xf32>
      %22 = vector.shape_cast %21 : vector<1x128xf32> to vector<1x1x128xf32>
      %cst_12 = arith.constant dense<0.000000e+00> : vector<1xf32>
      %23 = vector.multi_reduction <add>, %22, %cst_12 [1, 2] : vector<1x1x128xf32> to vector<1xf32>
      %24 = vector.shape_cast %23 : vector<1xf32> to vector<1x1x1xf32>
      %25 = vector.extract %24[0, 0, 0] : f32 from vector<1x1x1xf32>
      %c4_i32 = arith.constant 4 : i32
      %26 = vector.broadcast %c4_i32 : i32 to vector<1x128xi32>
      %27 = arith.cmpi eq, %20, %26 : vector<1x128xi32>
      %c0_13 = arith.constant 0 : index
      %c0_14 = arith.constant 0 : index
      %28 = vector.load %arg5[%c0_13, %c0_14] : memref<1x128xf32, #tpu.memory_space<vmem>>, vector<1x128xf32>
      %29 = vector.broadcast %25 : f32 to vector<1x128xf32>
      %30 = arith.select %27, %29, %28 : vector<1x128xi1>, vector<1x128xf32>
      %c0_15 = arith.constant 0 : index
      %c0_16 = arith.constant 0 : index
      %31 = vector.load %arg4[%c0_15, %c0_16] : memref<1x128xf32, #tpu.memory_space<vmem>>, vector<1x128xf32>
      tpu.vector_store %arg4[%c0_15, %c0_16], %30 {strides = array<i32>} : memref<1x128xf32, #tpu.memory_space<vmem>>, vector<1x128xf32>,
    } else {
    }
    return
  }
  func.func @transform_0(%arg0: i32) -> (i32, i32) {
    %c0_i32 = arith.constant 0 : i32
    %c0_i32_0 = arith.constant 0 : i32
    %c0_i32_1 = arith.constant 0 : i32
    return %c0_i32, %c0_i32_0 : i32, i32
  }
  func.func @transform_1(%arg0: i32) -> (i32, i32) {
    %c0_i32 = arith.constant 0 : i32
    %c0_i32_0 = arith.constant 0 : i32
    %c0_i32_1 = arith.constant 0 : i32
    return %c0_i32, %c0_i32_0 : i32, i32
  }
  func.func @transform_2(%arg0: i32) -> (i32, i32) {
    %c0_i32 = arith.constant 0 : i32
    %c0_i32_0 = arith.constant 0 : i32
    return %arg0, %c0_i32 : i32, i32
  }
  func.func @transform_3(%arg0: i32) -> (i32, i32) {
    %c0_i32 = arith.constant 0 : i32
    %c0_i32_0 = arith.constant 0 : i32
    %c0_i32_1 = arith.constant 0 : i32
    return %c0_i32, %c0_i32_0 : i32, i32
  }
}

module attributes {stable_mosaic.version = 11 : i64} {
  func.func @kernel(%arg0: i32, %arg1: memref<8x12xf32, #tpu.memory_space<vmem>>, %arg2: memref<8x6xf32, #tpu.memory_space<vmem>>, %arg3: memref<8x128xf32, #tpu.memory_space<vmem>>, %arg4: memref<1x128xf32, #tpu.memory_space<vmem>>, %arg5: memref<1x128xf32, #tpu.memory_space<vmem>>, %arg6: memref<1x128xf32, #tpu.memory_space<vmem>>) attributes {dimension_semantics = [#tpu.dimension_semantics<arbitrary>], iteration_bounds = array<i64: 1>, scalar_prefetch = 0 : i64, scratch_operands = 2 : i64, tpu.core_type = #tpu.core_type<tc>, window_params = [{pipeline_mode = #tpu.pipeline_mode<synchronous>, transform_indices = @transform_0, window_bounds = array<i64: 8, 12>}, {pipeline_mode = #tpu.pipeline_mode<synchronous>, transform_indices = @transform_1, window_bounds = array<i64: 8, 6>}, {transform_indices = @transform_2, window_bounds = array<i64: 8, 128>}, {pipeline_mode = #tpu.pipeline_mode<synchronous>, transform_indices = @transform_3, window_bounds = array<i64: 1, 128>}]} {
    %c0_i32 = arith.constant 0 : i32
    %0 = arith.cmpi eq, %arg0, %c0_i32 : i32
    %1 = arith.extui %0 : i1 to i32
    %c0_i32_0 = arith.constant 0 : i32
    %2 = arith.cmpi ne, %1, %c0_i32_0 : i32
    scf.if %2 {
      %cst_10 = arith.constant 0.000000e+00 : f32
      %20 = vector.broadcast %cst_10 : f32 to vector<1x128xf32>
      %c0_11 = arith.constant 0 : index
      %c0_12 = arith.constant 0 : index
      %21 = vector.load %arg6[%c0_11, %c0_12] : memref<1x128xf32, #tpu.memory_space<vmem>>, vector<1x128xf32>
      tpu.vector_store %arg6[%c0_11, %c0_12], %20 {strides = array<i32>} : memref<1x128xf32, #tpu.memory_space<vmem>>, vector<1x128xf32>,
      %c0_13 = arith.constant 0 : index
      %c0_14 = arith.constant 0 : index
      %22 = vector.load %arg1[%c0_13, %c0_14] : memref<8x12xf32, #tpu.memory_space<vmem>>, vector<8x12xf32>
      %c0_15 = arith.constant 0 : index
      %c0_16 = arith.constant 0 : index
      %23 = vector.load %arg2[%c0_15, %c0_16] : memref<8x6xf32, #tpu.memory_space<vmem>>, vector<8x6xf32>
      %24 = vector.extract_strided_slice %22 {offsets = [0, 0], sizes = [8, 2], strides = [1, 1]} : vector<8x12xf32> to vector<8x2xf32>
      %25 = arith.negf %24 : vector<8x2xf32>
      %26 = math.exp %25 : vector<8x2xf32>
      %cst_17 = arith.constant 1.000000e+00 : f32
      %27 = vector.broadcast %cst_17 : f32 to vector<8x2xf32>
      %28 = arith.addf %27, %26 : vector<8x2xf32>
      %29 = arith.divf %27, %28 : vector<8x2xf32>
      %30 = vector.extract_strided_slice %22 {offsets = [0, 2], sizes = [8, 2], strides = [1, 1]} : vector<8x12xf32> to vector<8x2xf32>
      %31 = math.exp %30 : vector<8x2xf32>
      %32 = vector.extract_strided_slice %29 {offsets = [0, 0], sizes = [8, 1], strides = [1, 1]} : vector<8x2xf32> to vector<8x1xf32>
      %33 = vector.extract_strided_slice %29 {offsets = [0, 1], sizes = [8, 1], strides = [1, 1]} : vector<8x2xf32> to vector<8x1xf32>
      %34 = vector.extract_strided_slice %31 {offsets = [0, 0], sizes = [8, 1], strides = [1, 1]} : vector<8x2xf32> to vector<8x1xf32>
      %35 = vector.extract_strided_slice %31 {offsets = [0, 1], sizes = [8, 1], strides = [1, 1]} : vector<8x2xf32> to vector<8x1xf32>
      %36 = vector.extract_strided_slice %23 {offsets = [0, 0], sizes = [8, 1], strides = [1, 1]} : vector<8x6xf32> to vector<8x1xf32>
      %37 = vector.extract_strided_slice %23 {offsets = [0, 1], sizes = [8, 1], strides = [1, 1]} : vector<8x6xf32> to vector<8x1xf32>
      %38 = vector.extract_strided_slice %23 {offsets = [0, 2], sizes = [8, 1], strides = [1, 1]} : vector<8x6xf32> to vector<8x1xf32>
      %39 = vector.extract_strided_slice %23 {offsets = [0, 3], sizes = [8, 1], strides = [1, 1]} : vector<8x6xf32> to vector<8x1xf32>
      %cst_18 = arith.constant 5.000000e-01 : f32
      %40 = vector.broadcast %cst_18 : f32 to vector<8x1xf32>
      %41 = arith.mulf %34, %40 : vector<8x1xf32>
      %42 = arith.subf %32, %41 : vector<8x1xf32>
      %cst_19 = arith.constant 5.000000e-01 : f32
      %43 = vector.broadcast %cst_19 : f32 to vector<8x1xf32>
      %44 = arith.mulf %35, %43 : vector<8x1xf32>
      %45 = arith.subf %33, %44 : vector<8x1xf32>
      %cst_20 = arith.constant 5.000000e-01 : f32
      %46 = vector.broadcast %cst_20 : f32 to vector<8x1xf32>
      %47 = arith.mulf %34, %46 : vector<8x1xf32>
      %48 = arith.addf %32, %47 : vector<8x1xf32>
      %cst_21 = arith.constant 5.000000e-01 : f32
      %49 = vector.broadcast %cst_21 : f32 to vector<8x1xf32>
      %50 = arith.mulf %35, %49 : vector<8x1xf32>
      %51 = arith.addf %33, %50 : vector<8x1xf32>
      %cst_22 = arith.constant 5.000000e-01 : f32
      %52 = vector.broadcast %cst_22 : f32 to vector<8x1xf32>
      %53 = arith.mulf %38, %52 : vector<8x1xf32>
      %54 = arith.subf %36, %53 : vector<8x1xf32>
      %cst_23 = arith.constant 5.000000e-01 : f32
      %55 = vector.broadcast %cst_23 : f32 to vector<8x1xf32>
      %56 = arith.mulf %39, %55 : vector<8x1xf32>
      %57 = arith.subf %37, %56 : vector<8x1xf32>
      %cst_24 = arith.constant 5.000000e-01 : f32
      %58 = vector.broadcast %cst_24 : f32 to vector<8x1xf32>
      %59 = arith.mulf %38, %58 : vector<8x1xf32>
      %60 = arith.addf %36, %59 : vector<8x1xf32>
      %cst_25 = arith.constant 5.000000e-01 : f32
      %61 = vector.broadcast %cst_25 : f32 to vector<8x1xf32>
      %62 = arith.mulf %39, %61 : vector<8x1xf32>
      %63 = arith.addf %37, %62 : vector<8x1xf32>
      %64 = arith.minimumf %48, %60 : vector<8x1xf32>
      %65 = arith.maximumf %42, %54 : vector<8x1xf32>
      %66 = arith.subf %64, %65 : vector<8x1xf32>
      %cst_26 = arith.constant 0.000000e+00 : f32
      %67 = vector.broadcast %cst_26 : f32 to vector<8x1xf32>
      %68 = arith.maximumf %66, %67 : vector<8x1xf32>
      %69 = arith.minimumf %51, %63 : vector<8x1xf32>
      %70 = arith.maximumf %45, %57 : vector<8x1xf32>
      %71 = arith.subf %69, %70 : vector<8x1xf32>
      %cst_27 = arith.constant 0.000000e+00 : f32
      %72 = vector.broadcast %cst_27 : f32 to vector<8x1xf32>
      %73 = arith.maximumf %71, %72 : vector<8x1xf32>
      %74 = arith.mulf %68, %73 : vector<8x1xf32>
      %75 = arith.subf %48, %42 : vector<8x1xf32>
      %76 = arith.subf %51, %45 : vector<8x1xf32>
      %77 = arith.subf %60, %54 : vector<8x1xf32>
      %78 = arith.subf %63, %57 : vector<8x1xf32>
      %79 = arith.mulf %75, %76 : vector<8x1xf32>
      %cst_28 = arith.constant 1.000000e-16 : f32
      %80 = vector.broadcast %cst_28 : f32 to vector<8x1xf32>
      %81 = arith.addf %79, %80 : vector<8x1xf32>
      %82 = arith.mulf %77, %78 : vector<8x1xf32>
      %83 = arith.addf %81, %82 : vector<8x1xf32>
      %84 = arith.subf %83, %74 : vector<8x1xf32>
      %85 = arith.divf %74, %84 : vector<8x1xf32>
      %cst_29 = arith.constant 1.000000e+00 : f32
      %86 = vector.broadcast %cst_29 : f32 to vector<8x1xf32>
      %87 = arith.subf %86, %85 : vector<8x1xf32>
      %88 = vector.shape_cast %87 : vector<8x1xf32> to vector<1x8x1xf32>
      %cst_30 = arith.constant dense<0.000000e+00> : vector<1xf32>
      %89 = vector.multi_reduction <add>, %88, %cst_30 [1, 2] : vector<1x8x1xf32> to vector<1xf32>
      %90 = vector.shape_cast %89 : vector<1xf32> to vector<1x1x1xf32>
      %91 = vector.extract %90[0, 0, 0] : f32 from vector<1x1x1xf32>
      %cst_31 = arith.constant 8.000000e+00 : f32
      %92 = arith.divf %91, %cst_31 : f32
      %93 = vector.extract_strided_slice %23 {offsets = [0, 2], sizes = [8, 1], strides = [1, 1]} : vector<8x6xf32> to vector<8x1xf32>
      %94 = vector.extract_strided_slice %23 {offsets = [0, 3], sizes = [8, 1], strides = [1, 1]} : vector<8x6xf32> to vector<8x1xf32>
      %95 = arith.mulf %93, %94 : vector<8x1xf32>
      %cst_32 = arith.constant 0.000000e+00 : f32
      %96 = vector.broadcast %cst_32 : f32 to vector<8x1xf32>
      %97 = arith.subf %96, %95 : vector<8x1xf32>
      %cst_33 = arith.constant 2.000000e+00 : f32
      %98 = vector.broadcast %cst_33 : f32 to vector<8x1xf32>
      %99 = arith.mulf %97, %98 : vector<8x1xf32>
      %100 = math.exp %99 : vector<8x1xf32>
      %101 = vector.shape_cast %100 : vector<8x1xf32> to vector<1x8x1xf32>
      %cst_34 = arith.constant dense<0.000000e+00> : vector<1xf32>
      %102 = vector.multi_reduction <add>, %101, %cst_34 [1, 2] : vector<1x8x1xf32> to vector<1xf32>
      %103 = vector.shape_cast %102 : vector<1xf32> to vector<1x1x1xf32>
      %104 = vector.extract %103[0, 0, 0] : f32 from vector<1x1x1xf32>
      %cst_35 = arith.constant 8.000000e+00 : f32
      %105 = arith.divf %104, %cst_35 : f32
      %106 = vector.extract_strided_slice %22 {offsets = [0, 4], sizes = [8, 1], strides = [1, 1]} : vector<8x12xf32> to vector<8x1xf32>
      %cst_36 = arith.constant 0.000000e+00 : f32
      %107 = vector.broadcast %cst_36 : f32 to vector<8x1xf32>
      %108 = arith.maximumf %85, %107 : vector<8x1xf32>
      %109 = arith.mulf %106, %108 : vector<8x1xf32>
      %110 = vector.shape_cast %109 : vector<8x1xf32> to vector<1x8x1xf32>
      %cst_37 = arith.constant dense<0.000000e+00> : vector<1xf32>
      %111 = vector.multi_reduction <add>, %110, %cst_37 [1, 2] : vector<1x8x1xf32> to vector<1xf32>
      %112 = vector.shape_cast %111 : vector<1xf32> to vector<1x1x1xf32>
      %113 = vector.extract %112[0, 0, 0] : f32 from vector<1x1x1xf32>
      %114 = vector.extract_strided_slice %22 {offsets = [0, 5], sizes = [8, 7], strides = [1, 1]} : vector<8x12xf32> to vector<8x7xf32>
      %115 = vector.extract_strided_slice %23 {offsets = [0, 5], sizes = [8, 1], strides = [1, 1]} : vector<8x6xf32> to vector<8x1xf32>
      %116 = arith.fptosi %115 : vector<8x1xf32> to vector<8x1xi32>
      %117 = tpu.iota {dimensions = array<i32: 1>} : vector<8x7xi32>
      %118 = vector.broadcast %116 : vector<8x1xi32> to vector<8x7xi32>
      %119 = arith.cmpi eq, %117, %118 : vector<8x7xi32>
      %cst_38 = arith.constant 0.000000e+00 : f32
      %120 = vector.broadcast %cst_38 : f32 to vector<8x7xf32>
      %121 = arith.select %119, %114, %120 : vector<8x7xi1>, vector<8x7xf32>
      %cst_39 = arith.constant dense<0.000000e+00> : vector<8xf32>
      %122 = vector.multi_reduction <add>, %121, %cst_39 [1] : vector<8x7xf32> to vector<8xf32>
      %123 = vector.shape_cast %122 : vector<8xf32> to vector<8x1xf32>
      %cst_40 = arith.constant dense<0xFF800000> : vector<8xf32>
      %124 = vector.multi_reduction <maximumf>, %114, %cst_40 [1] : vector<8x7xf32> to vector<8xf32>
      %125 = vector.shape_cast %124 : vector<8xf32> to vector<8x1xf32>
      %126 = vector.broadcast %125 : vector<8x1xf32> to vector<8x7xf32>
      %127 = arith.subf %114, %126 : vector<8x7xf32>
      %128 = math.exp %127 : vector<8x7xf32>
      %cst_41 = arith.constant dense<0.000000e+00> : vector<8xf32>
      %129 = vector.multi_reduction <add>, %128, %cst_41 [1] : vector<8x7xf32> to vector<8xf32>
      %130 = vector.shape_cast %129 : vector<8xf32> to vector<8x1xf32>
      %131 = math.log %130 : vector<8x1xf32>
      %132 = arith.addf %125, %131 : vector<8x1xf32>
      %133 = arith.subf %132, %123 : vector<8x1xf32>
      %134 = vector.shape_cast %133 : vector<8x1xf32> to vector<1x8x1xf32>
      %cst_42 = arith.constant dense<0.000000e+00> : vector<1xf32>
      %135 = vector.multi_reduction <add>, %134, %cst_42 [1, 2] : vector<1x8x1xf32> to vector<1xf32>
      %136 = vector.shape_cast %135 : vector<1xf32> to vector<1x1x1xf32>
      %137 = vector.extract %136[0, 0, 0] : f32 from vector<1x1x1xf32>
      %cst_43 = arith.constant 8.000000e+00 : f32
      %138 = arith.divf %137, %cst_43 : f32
      %139 = tpu.iota {dimensions = array<i32: 1>} : vector<1x128xi32>
      %c0_i32_44 = arith.constant 0 : i32
      %140 = vector.broadcast %c0_i32_44 : i32 to vector<1x128xi32>
      %141 = arith.cmpi eq, %139, %140 : vector<1x128xi32>
      %cst_45 = arith.constant 0.000000e+00 : f32
      %142 = vector.broadcast %92 : f32 to vector<1x128xf32>
      %143 = vector.broadcast %cst_45 : f32 to vector<1x128xf32>
      %144 = arith.select %141, %142, %143 : vector<1x128xi1>, vector<1x128xf32>
      %c1_i32 = arith.constant 1 : i32
      %145 = vector.broadcast %c1_i32 : i32 to vector<1x128xi32>
      %146 = arith.cmpi eq, %139, %145 : vector<1x128xi32>
      %147 = vector.broadcast %105 : f32 to vector<1x128xf32>
      %148 = arith.select %146, %147, %144 : vector<1x128xi1>, vector<1x128xf32>
      %c2_i32 = arith.constant 2 : i32
      %149 = vector.broadcast %c2_i32 : i32 to vector<1x128xi32>
      %150 = arith.cmpi eq, %139, %149 : vector<1x128xi32>
      %151 = vector.broadcast %138 : f32 to vector<1x128xf32>
      %152 = arith.select %150, %151, %148 : vector<1x128xi1>, vector<1x128xf32>
      %c3_i32 = arith.constant 3 : i32
      %153 = vector.broadcast %c3_i32 : i32 to vector<1x128xi32>
      %154 = arith.cmpi eq, %139, %153 : vector<1x128xi32>
      %155 = vector.broadcast %113 : f32 to vector<1x128xf32>
      %156 = arith.select %154, %155, %152 : vector<1x128xi1>, vector<1x128xf32>
      %c0_46 = arith.constant 0 : index
      %c0_47 = arith.constant 0 : index
      %157 = vector.load %arg5[%c0_46, %c0_47] : memref<1x128xf32, #tpu.memory_space<vmem>>, vector<1x128xf32>
      tpu.vector_store %arg5[%c0_46, %c0_47], %156 {strides = array<i32>} : memref<1x128xf32, #tpu.memory_space<vmem>>, vector<1x128xf32>,
    } else {
    }
    %c0 = arith.constant 0 : index
    %c0_1 = arith.constant 0 : index
    %3 = vector.load %arg3[%c0, %c0_1] : memref<8x128xf32, #tpu.memory_space<vmem>>, vector<8x128xf32>
    %cst = arith.constant 0.000000e+00 : f32
    %4 = vector.broadcast %cst : f32 to vector<8x128xf32>
    %5 = arith.maximumf %3, %4 : vector<8x128xf32>
    %6 = math.absf %3 : vector<8x128xf32>
    %cst_2 = arith.constant 0.000000e+00 : f32
    %7 = vector.broadcast %cst_2 : f32 to vector<8x128xf32>
    %8 = arith.subf %7, %6 : vector<8x128xf32>
    %9 = math.exp %8 : vector<8x128xf32>
    %10 = math.log1p %9 : vector<8x128xf32>
    %11 = arith.addf %5, %10 : vector<8x128xf32>
    %c0_3 = arith.constant 0 : index
    %c0_4 = arith.constant 0 : index
    %12 = vector.load %arg6[%c0_3, %c0_4] : memref<1x128xf32, #tpu.memory_space<vmem>>, vector<1x128xf32>
    %cst_5 = arith.constant dense<0.000000e+00> : vector<128xf32>
    %13 = vector.multi_reduction <add>, %11, %cst_5 [0] : vector<8x128xf32> to vector<128xf32>
    %14 = vector.shape_cast %13 : vector<128xf32> to vector<1x128xf32>
    %15 = arith.addf %12, %14 : vector<1x128xf32>
    %c0_6 = arith.constant 0 : index
    %c0_7 = arith.constant 0 : index
    %16 = vector.load %arg6[%c0_6, %c0_7] : memref<1x128xf32, #tpu.memory_space<vmem>>, vector<1x128xf32>
    tpu.vector_store %arg6[%c0_6, %c0_7], %15 {strides = array<i32>} : memref<1x128xf32, #tpu.memory_space<vmem>>, vector<1x128xf32>,
    %c0_i32_8 = arith.constant 0 : i32
    %17 = arith.cmpi eq, %arg0, %c0_i32_8 : i32
    %18 = arith.extui %17 : i1 to i32
    %c0_i32_9 = arith.constant 0 : i32
    %19 = arith.cmpi ne, %18, %c0_i32_9 : i32
    scf.if %19 {
      %20 = tpu.iota {dimensions = array<i32: 1>} : vector<1x128xi32>
      %c0_10 = arith.constant 0 : index
      %c0_11 = arith.constant 0 : index
      %21 = vector.load %arg6[%c0_10, %c0_11] : memref<1x128xf32, #tpu.memory_space<vmem>>, vector<1x128xf32>
      %22 = vector.shape_cast %21 : vector<1x128xf32> to vector<1x1x128xf32>
      %cst_12 = arith.constant dense<0.000000e+00> : vector<1xf32>
      %23 = vector.multi_reduction <add>, %22, %cst_12 [1, 2] : vector<1x1x128xf32> to vector<1xf32>
      %24 = vector.shape_cast %23 : vector<1xf32> to vector<1x1x1xf32>
      %25 = vector.extract %24[0, 0, 0] : f32 from vector<1x1x1xf32>
      %c4_i32 = arith.constant 4 : i32
      %26 = vector.broadcast %c4_i32 : i32 to vector<1x128xi32>
      %27 = arith.cmpi eq, %20, %26 : vector<1x128xi32>
      %c0_13 = arith.constant 0 : index
      %c0_14 = arith.constant 0 : index
      %28 = vector.load %arg5[%c0_13, %c0_14] : memref<1x128xf32, #tpu.memory_space<vmem>>, vector<1x128xf32>
      %29 = vector.broadcast %25 : f32 to vector<1x128xf32>
      %30 = arith.select %27, %29, %28 : vector<1x128xi1>, vector<1x128xf32>
      %c0_15 = arith.constant 0 : index
      %c0_16 = arith.constant 0 : index
      %31 = vector.load %arg4[%c0_15, %c0_16] : memref<1x128xf32, #tpu.memory_space<vmem>>, vector<1x128xf32>
      tpu.vector_store %arg4[%c0_15, %c0_16], %30 {strides = array<i32>} : memref<1x128xf32, #tpu.memory_space<vmem>>, vector<1x128xf32>,
    } else {
    }
    return
  }
  func.func @transform_0(%arg0: i32) -> (i32, i32) {
    %c0_i32 = arith.constant 0 : i32
    %c0_i32_0 = arith.constant 0 : i32
    %c0_i32_1 = arith.constant 0 : i32
    return %c0_i32, %c0_i32_0 : i32, i32
  }
  func.func @transform_1(%arg0: i32) -> (i32, i32) {
    %c0_i32 = arith.constant 0 : i32
    %c0_i32_0 = arith.constant 0 : i32
    %c0_i32_1 = arith.constant 0 : i32
    return %c0_i32, %c0_i32_0 : i32, i32
  }
  func.func @transform_2(%arg0: i32) -> (i32, i32) {
    %c0_i32 = arith.constant 0 : i32
    %c0_i32_0 = arith.constant 0 : i32
    return %arg0, %c0_i32 : i32, i32
  }
  func.func @transform_3(%arg0: i32) -> (i32, i32) {
    %c0_i32 = arith.constant 0 : i32
    %c0_i32_0 = arith.constant 0 : i32
    %c0_i32_1 = arith.constant 0 : i32
    return %c0_i32, %c0_i32_0 : i32, i32
  }
}

</mosaic_0001>

<bundles_post_ra>
// kernel: squeeze.12
= control target key start
LH: loop header
LB: loop body
LE: loop exit
PB: predicated region body
PF: predicated region fallthrough
CT: control target
= control target key end

     0   :  { %vm4_vm0 = vcmask 1047556   ;;  %s169_s14 = smov 96   ;;  %s170_s15 = smov 112   ;;  %vm6_vm1 = vcmask 130048   ;;  %vm21_vm2 = vcmask 1048448   ;;  %vm38_vm3 = vcmask 917248   ;;  %s314_s0 = inlined_call_operand.vmem [shape: f32[2,3,16,16,1], index: 0, kind: input, shape index: {}]   ;;  %s315_s1 = inlined_call_operand.vmem [shape: f32[1536], index: 1, kind: output, shape index: {}]  }
   0x1   :  { %v138_v0 = vld [vmem:[%s314_s0 + $0x6] ss:$8 sm:$0xf]   ;;  %v134_v3 = vld [vmem:[%s314_s0 + $0x7] ss:$8 sm:$0xf]  }
   0x2   :  { %v139_v1 = vld [vmem:[%s314_s0 + $0x6] ss:$8 sm:$0xf0]   ;;  %v135_v4 = vld [vmem:[%s314_s0 + $0x7] ss:$8 sm:$0xf0]  }
   0x3   :  { %v35_v2 = vsel %vm4_vm0, %v139_v1, %v138_v0  ;;  %v18_v5 = vsel %vm4_vm0, %v135_v4, %v134_v3  ;;  %v140_v6 = vld [vmem:[%s314_s0 + $0x46] ss:$8 sm:$0xf]   ;;  %v136_v7 = vld [vmem:[%s314_s0 + $0x47] ss:$8 sm:$0xf]  }
   0x4   :  { %36 = vrot.lane.b32.xlu1 %v35_v2, %s169_s14  ;;  %19 = vrot.lane.b32.xlu0 %v18_v5, %s170_s15  ;;  %v142_v8 = vld [vmem:[%s314_s0 + $0x5] ss:$8 sm:$0xf]   ;;  %v146_v12 = vld [vmem:[%s314_s0 + $0x4] ss:$8 sm:$0xf]  }
   0x5   :  { %v143_v9 = vld [vmem:[%s314_s0 + $0x5] ss:$8 sm:$0xf0]   ;;  %v147_v13 = vld [vmem:[%s314_s0 + $0x4] ss:$8 sm:$0xf0]  }
   0x6   :  { %v144_v10 = vld [vmem:[%s314_s0 + $0x45] ss:$8 sm:$0xf]   ;;  %v52_v11 = vsel %vm4_vm0, %v143_v9, %v142_v8  ;;  %s171_s30 = smov 80   ;;  %v69_v16 = vsel %vm4_vm0, %v147_v13, %v146_v12  ;;  %s173_s25 = smov 48   ;;  %vm55_vm4 = vcmask 786048  }
   0x7   :  { %v148_v14 = vld [vmem:[%s314_s0 + $0x44] ss:$8 sm:$0xf]   ;;  %v150_v15 = vld [vmem:[%s314_s0 + $0x3] ss:$8 sm:$0xf]  }
   0x8   :  { %42 = vrot.lane.b32.xlu1 %v140_v6, %s169_s14  ;;  %25 = vrot.lane.b32.xlu0 %v136_v7, %s170_s15  ;;  %v2_v17 = vld [vmem:[%s314_s0] ss:$8 sm:$0xf]   ;;  %v151_v19 = vld [vmem:[%s314_s0 + $0x3] ss:$8 sm:$0xf0]  }
   0x9   :  { %v3_v18 = vld [vmem:[%s314_s0] ss:$8 sm:$0xf0]   ;;  %s172_s14 = smov 64   ;;  %v86_v23 = vsel %vm4_vm0, %v151_v19, %v150_v15  ;;  %s174_s3 = smov 32   ;;  %vm72_vm5 = vcmask 654848  }
   0xa   :  { %v5_v20 = vsel %vm4_vm0, %v3_v18, %v2_v17  ;;  %v132_v21 = vld [vmem:[%s314_s0 + $0x40] ss:$8 sm:$0xf]   ;;  %v152_v22 = vld [vmem:[%s314_s0 + $0x43] ss:$8 sm:$0xf]  }
   0xb   :  { %7 = vst.msk [vmem:[%s315_s1] sm:$0xff] %vm6_vm1, %v5_v20   ;;  %133 = vst.msk [vmem:[%s315_s1 + $0x8] sm:$0xf] %vm6_vm1, %v132_v21   ;;  %v154_v24 = vld [vmem:[%s314_s0 + $0x2] ss:$8 sm:$0xf]  }
   0xc   :  { %59 = vrot.lane.b32.xlu1 %v144_v10, %s171_s30  ;;  %53 = vrot.lane.b32.xlu0 %v52_v11, %s171_s30  ;;  %v155_v25 = vld [vmem:[%s314_s0 + $0x2] ss:$8 sm:$0xf0]   ;;  %v158_v28 = vld [vmem:[%s314_s0 + $0x1] ss:$8 sm:$0xf]  }
   0xd   :  { %v156_v26 = vld [vmem:[%s314_s0 + $0x42] ss:$8 sm:$0xf]   ;;  %v103_v27 = vsel %vm4_vm0, %v155_v25, %v154_v24  ;;  %v159_v29 = vld [vmem:[%s314_s0 + $0x1] ss:$8 sm:$0xf0]  }
   0xe   :  { %v160_v30 = vld [vmem:[%s314_s0 + $0x41] ss:$8 sm:$0xf]   ;;  %v120_v31 = vsel %vm4_vm0, %v159_v29, %v158_v28  ;;  %s175_s0 = smov 16   ;;  %vm89_vm6 = vcmask 523648   ;;  %vm106_vm7 = vcmask 392448  }
   0xf   :  { %vm123_vm8 = vcmask 261248  }
  0x10   :  { %76 = vrot.lane.b32.xlu1 %v148_v14, %s172_s14  ;;  %70 = vrot.lane.b32.xlu0 %v69_v16, %s172_s14 }
  0x14   :  { %93 = vrot.lane.b32.xlu1 %v152_v22, %s173_s25  ;;  %87 = vrot.lane.b32.xlu0 %v86_v23, %s173_s25 }
  0x18   :  { %110 = vrot.lane.b32.xlu1 %v156_v26, %s174_s3  ;;  %104 = vrot.lane.b32.xlu0 %v103_v27, %s174_s3 }
  0x1c   :  { %127 = vrot.lane.b32.xlu1 %v160_v30, %s175_s0  ;;  %121 = vrot.lane.b32.xlu0 %v120_v31, %s175_s0 }
  0x76   :  { %v37_v32 = vpop.permute.xlu1 %36   ;;  %v20_v33 = vpop.permute.xlu0 %19  }
  0x77   :  { %22 = vst.msk [vmem:[%s315_s1] sm:$0xff] %vm21_vm2, %v20_v33  }
  0x78   :  { %39 = vst.msk [vmem:[%s315_s1] sm:$0xff] %vm38_vm3, %v37_v32  }
  0x7a   :  { %v43_v34 = vpop.permute.xlu1 %42   ;;  %v26_v35 = vpop.permute.xlu0 %25  }
  0x7b   :  { %137 = vst.msk [vmem:[%s315_s1 + $0x8] sm:$0xf] %vm21_vm2, %v26_v35  }
  0x7c   :  { %141 = vst.msk [vmem:[%s315_s1 + $0x8] sm:$0xf] %vm38_vm3, %v43_v34  }
  0x7e   :  { %v60_v36 = vpop.permute.xlu1 %59   ;;  %v54_v37 = vpop.permute.xlu0 %53  }
  0x7f   :  { %145 = vst.msk [vmem:[%s315_s1 + $0x8] sm:$0xf] %vm55_vm4, %v60_v36   ;;  %56 = vst.msk [vmem:[%s315_s1] sm:$0xff] %vm55_vm4, %v54_v37  }
  0x82   :  { %v77_v38 = vpop.permute.xlu1 %76   ;;  %v71_v39 = vpop.permute.xlu0 %70  }
  0x83   :  { %149 = vst.msk [vmem:[%s315_s1 + $0x8] sm:$0xf] %vm72_vm5, %v77_v38   ;;  %73 = vst.msk [vmem:[%s315_s1] sm:$0xff] %vm72_vm5, %v71_v39  }
  0x86   :  { %v94_v40 = vpop.permute.xlu1 %93   ;;  %v88_v41 = vpop.permute.xlu0 %87  }
  0x87   :  { %153 = vst.msk [vmem:[%s315_s1 + $0x8] sm:$0xf] %vm89_vm6, %v94_v40   ;;  %90 = vst.msk [vmem:[%s315_s1] sm:$0xff] %vm89_vm6, %v88_v41  }
  0x8a   :  { %v111_v42 = vpop.permute.xlu1 %110   ;;  %v105_v43 = vpop.permute.xlu0 %104  }
  0x8b   :  { %157 = vst.msk [vmem:[%s315_s1 + $0x8] sm:$0xf] %vm106_vm7, %v111_v42   ;;  %107 = vst.msk [vmem:[%s315_s1] sm:$0xff] %vm106_vm7, %v105_v43  }
  0x8e   :  { %v128_v44 = vpop.permute.xlu1 %127   ;;  %v122_v45 = vpop.permute.xlu0 %121  }
  0x8f   :  { %161 = vst.msk [vmem:[%s315_s1 + $0x8] sm:$0xf] %vm123_vm8, %v128_v44   ;;  %124 = vst.msk [vmem:[%s315_s1] sm:$0xff] %vm123_vm8, %v122_v45  }

// kernel: squeeze.18
= control target key start
LH: loop header
LB: loop body
LE: loop exit
PB: predicated region body
PF: predicated region fallthrough
CT: control target
= control target key end

     0   :  { %vm6_vm0 = vcmask 1042434   ;;  %s11_s6 = smov 3  ;;  %s33_s11 = smov 3  ;;  %vm8_vm1 = vcmask 64512   ;;  %vm19_vm2 = vcmask 1048512   ;;  %vm30_vm3 = vcmask 982912   ;;  %s367_s0 = inlined_call_operand.vmem [shape: f32[2,3,8,8], index: 0, kind: input, shape index: {}]   ;;  %s368_s1 = inlined_call_operand.vmem [shape: f32[384], index: 1, kind: output, shape index: {}]  }
   0x1   :  { %v183_v0 = vld [vmem:[%s367_s0 + $0x2d] sm:$0x4]   ;;  %v187_v2 = vld [vmem:[%s367_s0 + $0x2b] sm:$0x4]   ;;  %s22_s16 = smov 3  ;;  %s227_s19 = smov 120  }
   0x2   :  { %v182_v1 = vld [vmem:[%s367_s0 + $0xf] ss:$16 sm:%s11_s6]   ;;  %v186_v4 = vld [vmem:[%s367_s0 + $0xd] ss:$16 sm:%s33_s11]   ;;  %s44_s22 = smov 3  ;;  %s228_s25 = smov 104  }
   0x3   :  { %v16_v3 = vsel %vm6_vm0, %v183_v0, %v182_v1  ;;  %v185_v5 = vld [vmem:[%s367_s0 + $0x2c] sm:$0x4]   ;;  %v38_v6 = vsel %vm6_vm0, %v187_v2, %v186_v4  ;;  %v189_v8 = vld [vmem:[%s367_s0 + $0x2a] sm:$0x4]   ;;  %s55_s28 = smov 3  ;;  %s66_s4 = smov 3 }
   0x4   :  { %17 = vrot.lane.b32.xlu0 %v16_v3, %s227_s19  ;;  %v184_v7 = vld [vmem:[%s367_s0 + $0xe] ss:$16 sm:%s22_s16]   ;;  %39 = vrot.lane.b32.xlu1 %v38_v6, %s228_s25  ;;  %s77_s9 = smov 3  ;;  %s229_s10 = smov 112   ;;  %vm41_vm4 = vcmask 917312   ;;  %vm52_vm5 = vcmask 851712  }
   0x5   :  { %v27_v9 = vsel %vm6_vm0, %v185_v5, %v184_v7  ;;  %v188_v10 = vld [vmem:[%s367_s0 + $0xc] ss:$16 sm:%s44_s22]   ;;  %v190_v12 = vld [vmem:[%s367_s0 + $0xb] ss:$16 sm:%s55_s28]   ;;  %s88_s11 = smov 3  ;;  %s230_s12 = smov 96  }
   0x6   :  { %v49_v11 = vsel %vm6_vm0, %v189_v8, %v188_v10  ;;  %v191_v13 = vld [vmem:[%s367_s0 + $0x29] sm:$0x4]   ;;  %v192_v14 = vld [vmem:[%s367_s0 + $0xa] ss:$16 sm:%s66_s4]   ;;  %v195_v19 = vld [vmem:[%s367_s0 + $0x27] sm:$0x4]  }
   0x7   :  { %v193_v15 = vld [vmem:[%s367_s0 + $0x28] sm:$0x4]   ;;  %v60_v16 = vsel %vm6_vm0, %v191_v13, %v190_v12  ;;  %v194_v18 = vld [vmem:[%s367_s0 + $0x9] ss:$16 sm:%s77_s9]   ;;  %v197_v21 = vld [vmem:[%s367_s0 + $0x26] sm:$0x4]  }
   0x8   :  { %28 = vrot.lane.b32.xlu0 %v27_v9, %s229_s10  ;;  %50 = vrot.lane.b32.xlu1 %v49_v11, %s230_s12  ;;  %v71_v17 = vsel %vm6_vm0, %v193_v15, %v192_v14  ;;  %v196_v20 = vld [vmem:[%s367_s0 + $0x8] ss:$16 sm:%s88_s11]   ;;  %s99_s21 = smov 3  ;;  %s231_s22 = smov 88   ;;  %v82_v22 = vsel %vm6_vm0, %v195_v19, %v194_v18  ;;  %vm63_vm6 = vcmask 786112   ;;  %vm74_vm7 = vcmask 720512  }
   0x9   :  { %s110_s23 = smov 3  ;;  %s232_s24 = smov 80   ;;  %v93_v23 = vsel %vm6_vm0, %v197_v21, %v196_v20  ;;  %v198_v24 = vld [vmem:[%s367_s0 + $0x7] ss:$16 sm:%s99_s21]   ;;  %v201_v27 = vld [vmem:[%s367_s0 + $0x24] sm:$0x4]  }
   0xa   :  { %v199_v25 = vld [vmem:[%s367_s0 + $0x25] sm:$0x4]   ;;  %v200_v26 = vld [vmem:[%s367_s0 + $0x6] ss:$16 sm:%s110_s23]   ;;  %s121_s4 = smov 3  ;;  %s233_s5 = smov 72  }
   0xb   :  { %s132_s6 = smov 3  ;;  %s2_s7 = smov 3  ;;  %v181_v28 = vld [vmem:[%s367_s0 + $0x1e] sm:$0x4]   ;;  %v104_v29 = vsel %vm6_vm0, %v199_v25, %v198_v24  ;;  %v115_v31 = vsel %vm6_vm0, %v201_v27, %v200_v26  ;;  %v202_v32 = vld [vmem:[%s367_s0 + $0x5] ss:$16 sm:%s121_s4]  }
   0xc   :  { %61 = vrot.lane.b32.xlu0 %v60_v16, %s231_s22  ;;  %72 = vrot.lane.b32.xlu1 %v71_v17, %s232_s24  ;;  %s234_s10 = smov 64   ;;  %v3_v30 = vld [vmem:[%s367_s0] ss:$16 sm:%s2_s7]   ;;  %s143_s21 = smov 3  ;;  %vm85_vm8 = vcmask 654912   ;;  %vm96_vm9 = vcmask 589312  }
   0xd   :  { %v203_v33 = vld [vmem:[%s367_s0 + $0x23] sm:$0x4]   ;;  %v7_v34 = vsel %vm6_vm0, %v181_v28, %v3_v30  ;;  %v204_v35 = vld [vmem:[%s367_s0 + $0x4] ss:$16 sm:%s132_s6]   ;;  %s235_s22 = smov 56   ;;  %s154_s23 = smov 3 }
   0xe   :  { %v205_v36 = vld [vmem:[%s367_s0 + $0x22] sm:$0x4]   ;;  %9 = vst.msk [vmem:[#allocation0] sm:$0x7] %vm8_vm1, %v7_v34   ;;  %s236_s24 = smov 48   ;;  %v126_v37 = vsel %vm6_vm0, %v203_v33, %v202_v32  ;;  %s165_s4 = smov 3 }
   0xf   :  { %v137_v38 = vsel %vm6_vm0, %v205_v36, %v204_v35  ;;  %v206_v39 = vld [vmem:[%s367_s0 + $0x3] ss:$16 sm:%s143_s21]   ;;  %v208_v41 = vld [vmem:[%s367_s0 + $0x2] ss:$16 sm:%s154_s23]   ;;  %s238_s6 = smov 32   ;;  %s240_s11 = smov 16  }
  0x10   :  { %83 = vrot.lane.b32.xlu0 %v82_v22, %s233_s5  ;;  %94 = vrot.lane.b32.xlu1 %v93_v23, %s234_s10  ;;  %v207_v40 = vld [vmem:[%s367_s0 + $0x21] sm:$0x4]   ;;  %v209_v42 = vld [vmem:[%s367_s0 + $0x20] sm:$0x4]   ;;  %s237_s5 = smov 40   ;;  %s241_s12 = smov 8  }
  0x11   :  { %v148_v43 = vsel %vm6_vm0, %v207_v40, %v206_v39  ;;  %v159_v44 = vsel %vm6_vm0, %v209_v42, %v208_v41  ;;  %v210_v45 = vld [vmem:[%s367_s0 + $0x1] ss:$16 sm:%s165_s4]   ;;  %vm107_vm10 = vcmask 523712   ;;  %vm118_vm11 = vcmask 458112  }
  0x12   :  { %v211_v46 = vld [vmem:[%s367_s0 + $0x1f] sm:$0x4]   ;;  %s239_s0 = smov 24   ;;  %vm129_vm12 = vcmask 392512   ;;  %vm140_vm13 = vcmask 326912   ;;  %vm151_vm14 = vcmask 261312  }
  0x13   :  { %v170_v47 = vsel %vm6_vm0, %v211_v46, %v210_v45  ;;  %vm162_vm15 = vcmask 195712   ;;  %vm173_vm0 = vcmask 130112  }
  0x14   :  { %105 = vrot.lane.b32.xlu0 %v104_v29, %s235_s22  ;;  %116 = vrot.lane.b32.xlu1 %v115_v31, %s236_s24 }
  0x18   :  { %127 = vrot.lane.b32.xlu0 %v126_v37, %s237_s5  ;;  %138 = vrot.lane.b32.xlu1 %v137_v38, %s238_s6 }
  0x1c   :  { %149 = vrot.lane.b32.xlu0 %v148_v43, %s239_s0  ;;  %160 = vrot.lane.b32.xlu1 %v159_v44, %s240_s11 }
  0x20   :  { %171 = vrot.lane.b32.xlu0 %v170_v47, %s241_s12 }
  0x76   :  { %v18_v48 = vpop.permute.xlu0 %17   ;;  %v40_v49 = vpop.permute.xlu1 %39  }
  0x77   :  { %20 = vst.msk [vmem:[#allocation0] sm:$0x7] %vm19_vm2, %v18_v48  }
  0x7a   :  { %v29_v50 = vpop.permute.xlu0 %28   ;;  %v51_v51 = vpop.permute.xlu1 %50  }
  0x7b   :  { %31 = vst.msk [vmem:[#allocation0] sm:$0x7] %vm30_vm3, %v29_v50  }
  0x7c   :  { %42 = vst.msk [vmem:[#allocation0] sm:$0x7] %vm41_vm4, %v40_v49  }
  0x7d   :  { %53 = vst.msk [vmem:[#allocation0] sm:$0x7] %vm52_vm5, %v51_v51  }
  0x7e   :  { %v62_v52 = vpop.permute.xlu0 %61   ;;  %v73_v53 = vpop.permute.xlu1 %72  }
  0x7f   :  { %64 = vst.msk [vmem:[#allocation0] sm:$0x7] %vm63_vm6, %v62_v52  }
  0x80   :  { %75 = vst.msk [vmem:[#allocation0] sm:$0x7] %vm74_vm7, %v73_v53  }
  0x82   :  { %v84_v54 = vpop.permute.xlu0 %83   ;;  %v95_v55 = vpop.permute.xlu1 %94  }
  0x83   :  { %86 = vst.msk [vmem:[#allocation0] sm:$0x7] %vm85_vm8, %v84_v54  }
  0x84   :  { %97 = vst.msk [vmem:[#allocation0] sm:$0x7] %vm96_vm9, %v95_v55  }
  0x86   :  { %v106_v56 = vpop.permute.xlu0 %105   ;;  %v117_v57 = vpop.permute.xlu1 %116  }
  0x87   :  { %108 = vst.msk [vmem:[#allocation0] sm:$0x7] %vm107_vm10, %v106_v56  }
  0x88   :  { %119 = vst.msk [vmem:[#allocation0] sm:$0x7] %vm118_vm11, %v117_v57  }
  0x8a   :  { %v128_v58 = vpop.permute.xlu0 %127   ;;  %v139_v59 = vpop.permute.xlu1 %138  }
  0x8b   :  { %130 = vst.msk [vmem:[#allocation0] sm:$0x7] %vm129_vm12, %v128_v58  }
  0x8c   :  { %141 = vst.msk [vmem:[#allocation0] sm:$0x7] %vm140_vm13, %v139_v59  }
  0x8e   :  { %v150_v60 = vpop.permute.xlu0 %149   ;;  %v161_v61 = vpop.permute.xlu1 %160  }
  0x8f   :  { %152 = vst.msk [vmem:[#allocation0] sm:$0x7] %vm151_vm14, %v150_v60  }
  0x90   :  { %163 = vst.msk [vmem:[#allocation0] sm:$0x7] %vm162_vm15, %v161_v61  }
  0x92   :  { %v172_v62 = vpop.permute.xlu0 %171  }
  0x93   :  { %174 = vst.msk [vmem:[#allocation0] sm:$0x7] %vm173_vm0, %v172_v62  }
  0x9a   :  { %v178_v63 = vld [vmem:[#allocation0] sm:$0xf] }
  0x9b   :  { %180 = vst [vmem:[%s368_s1] sm:$0xf] %v178_v63 }

// kernel: smart_cash_loss.2
= control target key start
LH: loop header
LB: loop body
LE: loop exit
PB: predicated region body
PF: predicated region fallthrough
CT: control target
= control target key end

     0   :  { %vm146_vm0 = vcmask 97320   ;;  %s301_s16 = smov 126   ;;  %v302_v7 = vmov 5   ;;  %vm142_vm1 = vcmask 56320   ;;  %s305_s17 = smov 4   ;;  %v131_v44 = vlaneseq  ;;  %s384_s0 = inlined_call_operand.vmem [shape: f32[8,12], index: 0, kind: input, shape index: {}]   ;;  %s385_s1 = inlined_call_operand.vmem [shape: f32[8,6], index: 1, kind: input, shape index: {}]   ;;  %s386_s2 = inlined_call_operand.vmem [shape: f32[16,128], index: 2, kind: input, shape index: {}]   ;;  %s387_s3 = inlined_call_operand.vmem [shape: f32[1,128], index: 3, kind: output, shape index: {}]  }
   0x1   :  { %v331_v0 = vld [vmem:[%s384_s0] sm:$0xff]  ;;  %278 = vset.pattern.permute.xlu0 %v302_v7  ;;  %s303_s0 = smov 127   ;;  %v191_v57 = vld [vmem:[%s386_s2 + $0x8] sm:$0xff]  ;;  %vm70_vm5 = vcmask 7168   ;;  %vm238_vm6 = vcmask 1040384  }
   0x2   :  { %v147_v1 = vsel %vm146_vm0, %v331_v0, -inf  ;;  %v27_v2 = vmul.f32 1.442695, %v331_v0  ;;  %v338_v4 = vld [vmem:[%s385_s1] sm:$0xff]  ;;  %v258_v8 = vmul.f32 -1.442695, %v331_v0 }
   0x3   :  { %148 = vmax.xlane.f32.xlu1 %v147_v1  ;;  %v36_v6 = vmul.f32 0.5, %v338_v4  ;;  %s304_s1 = smov 123   ;;  %v265_v27 = vtrunc.f32 %v338_v4  ;;  %v357_v46 = vand.u32 127, %v131_v44  ;;  %v190_v56 = vld [vmem:[%s386_s2] sm:$0xff]  ;;  %v195_v59 = vand.u32 2147483647, %v191_v57 }
   0x4   :  { %279 = vpow2.f32 %v27_v2  ;;  %v194_v58 = vand.u32 2147483647, %v190_v56  ;;  %s307_s2 = smov 124  }
   0x5   :  { %281 = vpow2.f32 %v258_v8  ;;  %v266_v29 = vcvt.f32.s32 %v265_v27  ;;  %v197_v61 = vsub.f32 0.0, %v195_v59  ;;  %v306_v27 = vmov 0.0  }
   0x6   :  { %v196_v60 = vsub.f32 0.0, %v194_v58  ;;  %18 = vst [vmem:[#allocation3] sm:$0x1] %v306_v27  ;;  %vm177_vm7 = vcmp.eq.s32.totalorder %v357_v46, 0  ;;  %vm180_vm8 = vcmp.eq.s32.totalorder %v357_v46, 1  ;;  %vm183_vm9 = vcmp.eq.s32.totalorder %v357_v46, 2 }
   0x7   :  { %v200_v63 = vmul.f32 1.442695, %v197_v61  ;;  %vm186_vm10 = vcmp.eq.s32.totalorder %v357_v46, 3  ;;  %vm249_vm11 = vcmp.eq.s32.totalorder %v357_v46, 4 }
   0x8   :  { %v198_v62 = vmul.f32 1.442695, %v196_v60 }
   0xe   :  { %v280_v3 = vpop.eup %279 }
   0xf   :  { %v29_v5 = vmul.f32 0.5, %v280_v3  ;;  %v282_v9 = vpop.eup %281 }
  0x10   :  { %v24_v10 = vadd.f32 1.0, %v282_v9 }
  0x11   :  { %31 = vrot.lane.b32.xlu0 %v29_v5, %s301_s16 }
  0x12   :  { %283 = vrcp.f32 %v24_v10 }
  0x15   :  { %38 = vrot.lane.b32.xlu0 %v36_v6, %s301_s16 }
  0x1c   :  { %v284_v11 = vpop.eup %283 }
  0x83   :  { %v32_v12 = vpop.permute.xlu0 %31 }
  0x84   :  { %v34_v13 = vsub.f32 %v284_v11, %v32_v12  ;;  %v35_v14 = vadd.f32 %v284_v11, %v32_v12 }
  0x86   :  { %v52_v15 = vsub.f32 %v35_v14, %v34_v13 }
  0x87   :  { %v39_v16 = vpop.permute.xlu0 %38 }
  0x88   :  { %v41_v17 = vsub.f32 %v338_v4, %v39_v16  ;;  %v42_v18 = vadd.f32 %v39_v16, %v338_v4  ;;  %55 = vrot.lane.b32.xlu1 %v52_v15, %s303_s0  ;;  %v192_v16 = vmax.f32 %v190_v56, 0.0 }
  0x8a   :  { %v43_v19 = vmin.f32 %v35_v14, %v42_v18  ;;  %v44_v20 = vmax.f32 %v34_v13, %v41_v17  ;;  %v53_v21 = vsub.f32 %v42_v18, %v41_v17  ;;  %v193_v17 = vmax.f32 %v191_v57, 0.0 }
  0x8c   :  { %61 = vrot.lane.b32.xlu0 %v53_v21, %s303_s0  ;;  %v45_v22 = vsub.f32 %v43_v19, %v44_v20  ;;  %85 = vrot.lane.b32.xlu1 %v338_v4, %s303_s0 }
  0x8e   :  { %v46_v23 = vmax.f32 %v45_v22, 0.0 }
  0x90   :  { %v347_v24 = vpop.xlane.xlu1 %148  ;;  %48 = vrot.lane.b32.xlu0 %v46_v23, %s303_s0  ;;  %138 = vrot.lane.b32.xlu1 %v331_v0, %s304_s1 }
  0x91   :  { %v150_v25 = vsub.f32 %v331_v0, %v347_v24 }
  0x93   :  { %v151_v26 = vmul.f32 1.442695, %v150_v25 }
  0x95   :  { %285 = vpow2.f32 %v151_v26 }
  0x9f   :  { %v286_v28 = vpop.eup %285 }
  0xa0   :  { %154 = vrot.lane.b32.xlu0 %v286_v28, %s304_s1 }
  0xa4   :  { %134 = vperm.xlu0 %278, %v266_v29  }
  0xfa   :  { %v56_v30 = vpop.permute.xlu1 %55 }
  0xfb   :  { %v58_v31 = vmul.f32 %v56_v30, %v52_v15 }
  0xfd   :  { %v59_v34 = vadd.f32 1e-16, %v58_v31  ;;  %v222_v31 = vld [vmem:[#allocation3] sm:$0x1] }
  0xfe   :  { %v62_v32 = vpop.permute.xlu0 %61  ;;  %v86_v45 = vpop.permute.xlu1 %85 }
  0xff   :  { %v64_v33 = vmul.f32 %v62_v32, %v53_v21  ;;  %v88_v49 = vmul.f32 %v86_v45, %v338_v4 }
 0x101   :  { %v65_v36 = vadd.f32 %v64_v33, %v59_v34  ;;  %v89_v51 = vsub.f32 0.0, %v88_v49 }
 0x102   :  { %v49_v35 = vpop.permute.xlu0 %48  ;;  %v139_v48 = vpop.permute.xlu1 %138 }
 0x103   :  { %v51_v37 = vmul.f32 %v49_v35, %v46_v23  ;;  %v90_v53 = vmul.f32 2.0, %v89_v51 }
 0x105   :  { %v66_v38 = vsub.f32 %v65_v36, %v51_v37  ;;  %v91_v54 = vmul.f32 1.442695, %v90_v53 }
 0x107   :  { %287 = vrcp.f32 %v66_v38 }
 0x108   :  { %289 = vpow2.f32 %v91_v54 }
 0x109   :  { %291 = vpow2.f32 %v198_v62 }
 0x10a   :  { %293 = vpow2.f32 %v200_v63 }
 0x111   :  { %v288_v39 = vpop.eup %287 }
 0x112   :  { %v353_v40 = vmul.f32 %v288_v39, %v51_v37  ;;  %v155_v41 = vpop.permute.xlu0 %154  ;;  %v290_v55 = vpop.eup %289 }
 0x113   :  { %v157_v42 = vsel %vm142_vm1, %v155_v41, 0.0  ;;  %v292_v1 = vpop.eup %291 }
 0x114   :  { %158 = vadd.xlane.f32.xlu1 %v157_v42  ;;  %v110_v43 = vmax.f32 %v353_v40, 0.0  ;;  %v294_v2 = vpop.eup %293  ;;  %v202_v3 = vadd.f32 1.0, %v292_v1  ;;  %v205_v5 = vmul.f32 -0.5, %v292_v1  ;;  %v208_v10 = vand.u32 2147483647, %v292_v1 }
 0x115   :  { %v211_v4 = vadd.f32 1.0, %v294_v2  ;;  %v214_v6 = vmul.f32 -0.5, %v294_v2  ;;  %v217_v11 = vand.u32 2147483647, %v294_v2  ;;  %v69_v36 = vsub.f32 1.0, %v353_v40 }
 0x116   :  { %112 = vrot.lane.b32.xlu0 %v110_v43, %s305_s17  ;;  %295 = vlog2.f32 %v202_v3  ;;  %v206_v7 = vadd.f32 1.0, %v205_v5  ;;  %vm209_vm3 = vcmp.lt.f32.partialorder %v208_v10, 0.0004427343 }
 0x117   :  { %297 = vlog2.f32 %v211_v4  ;;  %v215_v8 = vadd.f32 1.0, %v214_v6  ;;  %vm218_vm4 = vcmp.lt.f32.partialorder %v217_v11, 0.0004427343  ;;  %v71_v38 = vsel %vm70_vm5, %v69_v36, 0.0 }
 0x118   :  { %v207_v14 = vmul.f32 %v292_v1, %v206_v7 }
 0x119   :  { %v216_v15 = vmul.f32 %v294_v2, %v215_v8 }
 0x120   :  { %v296_v9 = vpop.eup %295 }
 0x121   :  { %v298_v12 = vpop.eup %297  ;;  %v204_v13 = vmul.f32 0.6931472, %v296_v9 }
 0x122   :  { %v213_v18 = vmul.f32 0.6931472, %v298_v12 }
 0x123   :  { %v135_v47 = vpop.permute.xlu0 %134  ;;  %v210_v19 = vsel %vm209_vm3, %v207_v14, %v204_v13 }
 0x124   :  { %vm136_vm2 = vcmp.eq.s32.totalorder %v357_v46, %v135_v47  ;;  %v219_v20 = vsel %vm218_vm4, %v216_v15, %v213_v18  ;;  %v220_v21 = vadd.f32 %v210_v19, %v192_v16 }
 0x125   :  { %v141_v50 = vsel %vm136_vm2, %v139_v48, 0.0  ;;  %v221_v22 = vadd.f32 %v219_v20, %v193_v17 }
 0x126   :  { %v143_v52 = vsel %vm142_vm1, %v141_v50, 0.0 }
 0x127   :  { %v223_v23 = vadd.f32 %v221_v22, %v220_v21 }
 0x129   :  { %v224_v25 = vrot.slane %v223_v23, 4 }
 0x12b   :  { %v225_v26 = vadd.f32 %v224_v25, %v223_v23 }
 0x12d   :  { %v226_v28 = vrot.slane %v225_v26, 2 }
 0x12f   :  { %v227_v29 = vadd.f32 %v226_v28, %v225_v26 }
 0x131   :  { %v228_v30 = vrot.slane %v227_v29, 1 }
 0x133   :  { %v229_v32 = vadd.f32 %v228_v30, %v227_v29 }
 0x135   :  { %144 = vadd.xlane.f32.xlu0 %v143_v52  ;;  %v230_v33 = vadd.f32 %v229_v32, %v222_v31 }
 0x137   :  { %231 = vst [vmem:[#allocation3] sm:$0x1] %v230_v33 }
 0x13e   :  { %v237_v48 = vld [vmem:[#allocation3] sm:$0x1] }
 0x13f   :  { %v239_v50 = vsel %vm238_vm6, %v237_v48, 0.0 }
 0x14b   :  { %94 = vrot.lane.b32.xlu0 %v290_v55, %s301_s16 }
 0x188   :  { %v113_v34 = vpop.permute.xlu0 %112 }
 0x189   :  { %v115_v35 = vmul.f32 %v113_v34, %v331_v0 }
 0x18b   :  { %117 = vrot.lane.b32.xlu1 %v115_v35, %s307_s2 }
 0x1a1   :  { %v159_v37 = vpop.xlane.xlu1 %158 }
 0x1a2   :  { %299 = vlog2.f32 %v159_v37 }
 0x1ac   :  { %v300_v39 = vpop.eup %299 }
 0x1ad   :  { %v161_v41 = vmul.f32 0.6931472, %v300_v39 }
 0x1af   :  { %72 = vadd.xlane.f32.xlu1 %v71_v38  ;;  %v162_v42 = vadd.f32 %v161_v41, %v347_v24 }
 0x1c2   :  { %v145_v43 = vpop.xlane.xlu0 %144 }
 0x1c3   :  { %v163_v44 = vsub.f32 %v162_v42, %v145_v43 }
 0x1c5   :  { %v164_v45 = vsel %vm70_vm5, %v163_v44, 0.0 }
 0x1c6   :  { %165 = vadd.xlane.f32.xlu1 %v164_v45  ;;  %v95_v0 = vpop.permute.xlu0 %94 }
 0x1c7   :  { %v97_v47 = vsel %vm70_vm5, %v95_v0, 0.0 }
 0x1c8   :  { %98 = vadd.xlane.f32.xlu0 %v97_v47 }
 0x1fd   :  { %v118_v40 = vpop.permute.xlu1 %117 }
 0x1fe   :  { %v120_v49 = vsel %vm70_vm5, %v118_v40, 0.0 }
 0x1ff   :  { %121 = vadd.xlane.f32.xlu0 %v120_v49 }
 0x203   :  { %240 = vadd.xlane.f32.xlu0 %v239_v50 }
 0x23c   :  { %v73_v51 = vpop.xlane.xlu1 %72 }
 0x23d   :  { %v74_v52 = vrot.slane %v73_v51, 4 }
 0x23f   :  { %v75_v24 = vadd.f32 %v74_v52, %v73_v51 }
 0x241   :  { %v76_v53 = vrot.slane %v75_v24, 2 }
 0x243   :  { %v77_v54 = vadd.f32 %v76_v53, %v75_v24 }
 0x245   :  { %v78_v55 = vrot.slane %v77_v54, 1 }
 0x247   :  { %v79_v56 = vadd.f32 %v78_v55, %v77_v54 }
 0x249   :  { %259 = vpush %v79_v56 }
 0x253   :  { %v166_v1 = vpop.xlane.xlu1 %165 }
 0x254   :  { %v167_v2 = vrot.slane %v166_v1, 4 }
 0x255   :  { %v99_v57 = vpop.xlane.xlu0 %98 }
 0x256   :  { %v100_v58 = vrot.slane %v99_v57, 4  ;;  %v168_v3 = vadd.f32 %v167_v2, %v166_v1 }
 0x258   :  { %v101_v59 = vadd.f32 %v100_v58, %v99_v57  ;;  %v169_v4 = vrot.slane %v168_v3, 2 }
 0x25a   :  { %v102_v60 = vrot.slane %v101_v59, 2  ;;  %v170_v8 = vadd.f32 %v169_v4, %v168_v3 }
 0x25c   :  { %v103_v61 = vadd.f32 %v102_v60, %v101_v59  ;;  %v171_v14 = vrot.slane %v170_v8, 1 }
 0x25e   :  { %v104_v62 = vrot.slane %v103_v61, 1  ;;  %v172_v19 = vadd.f32 %v171_v14, %v170_v8 }
 0x260   :  { %v105_v63 = vadd.f32 %v104_v62, %v103_v61 }
 0x262   :  { %261 = vpush %v105_v63 }
 0x27a   :  { %s260_s22 = spop %259 }
 0x27b   :  { %s83_s24 = smul.f32 0.125, %s260_s22 }
 0x27d   :  { %v178_v22 = vstv %s83_s24 }
 0x27e   :  { %v179_v25 = vsel %vm177_vm7, %v178_v22, 0.0 }
 0x28c   :  { %v122_v5 = vpop.xlane.xlu0 %121 }
 0x28d   :  { %v123_v6 = vrot.slane %v122_v5, 4 }
 0x28f   :  { %v124_v7 = vadd.f32 %v123_v6, %v122_v5 }
 0x290   :  { %v241_v9 = vpop.xlane.xlu0 %240 }
 0x291   :  { %v125_v10 = vrot.slane %v124_v7, 2  ;;  %v242_v11 = vrot.slane %v241_v9, 4 }
 0x293   :  { %v243_v12 = vadd.f32 %v242_v11, %v241_v9  ;;  %v126_v13 = vadd.f32 %v125_v10, %v124_v7  ;;  %s262_s23 = spop %261 }
 0x294   :  { %s109_s25 = smul.f32 0.125, %s262_s23 }
 0x295   :  { %v244_v15 = vrot.slane %v243_v12, 2  ;;  %v127_v16 = vrot.slane %v126_v13, 1 }
 0x296   :  { %v181_v23 = vstv %s109_s25 }
 0x297   :  { %v245_v17 = vadd.f32 %v244_v15, %v243_v12  ;;  %v128_v18 = vadd.f32 %v127_v16, %v126_v13  ;;  %v182_v26 = vsel %vm180_vm8, %v181_v23, %v179_v25 }
 0x299   :  { %263 = vpush %v128_v18  ;;  %v246_v20 = vrot.slane %v245_v17, 1 }
 0x29a   :  { %267 = vpush %v172_v19 }
 0x29b   :  { %v247_v21 = vadd.f32 %v246_v20, %v245_v17 }
 0x29d   :  { %269 = vpush %v247_v21 }
 0x2ca   :  { %s264_s26 = spop %263 }
 0x2cb   :  { %s268_s27 = spop %267  ;;  %v187_v28 = vstv %s264_s26 }
 0x2cc   :  { %s176_s28 = smul.f32 0.125, %s268_s27 }
 0x2ce   :  { %v184_v27 = vstv %s176_s28  ;;  %s270_s29 = spop %269 }
 0x2cf   :  { %v185_v29 = vsel %vm183_vm9, %v184_v27, %v182_v26  ;;  %v251_v32 = vstv %s270_s29 }
 0x2d0   :  { %v188_v30 = vsel %vm186_vm10, %v187_v28, %v185_v29 }
 0x2d1   :  { %189 = vst [vmem:[#allocation2] sm:$0x1] %v188_v30 }
 0x2d8   :  { %v250_v31 = vld [vmem:[#allocation2] sm:$0x1] }
 0x2d9   :  { %v252_v33 = vsel %vm249_vm11, %v251_v32, %v250_v31 }
 0x2da   :  { %253 = vst [vmem:[%s387_s3] sm:$0x1] %v252_v33 }

// kernel: smart_cash_loss.3
= control target key start
LH: loop header
LB: loop body
LE: loop exit
PB: predicated region body
PF: predicated region fallthrough
CT: control target
= control target key end

     0   :  { %vm146_vm0 = vcmask 97320   ;;  %s280_s16 = smov 126   ;;  %v281_v7 = vmov 5   ;;  %vm142_vm1 = vcmask 56320   ;;  %s284_s17 = smov 4   ;;  %v131_v44 = vlaneseq  ;;  %s356_s0 = inlined_call_operand.vmem [shape: f32[8,12], index: 0, kind: input, shape index: {}]   ;;  %s357_s1 = inlined_call_operand.vmem [shape: f32[8,6], index: 1, kind: input, shape index: {}]   ;;  %s358_s2 = inlined_call_operand.vmem [shape: f32[8,128], index: 2, kind: input, shape index: {}]   ;;  %s359_s3 = inlined_call_operand.vmem [shape: f32[1,128], index: 3, kind: output, shape index: {}]  }
   0x1   :  { %v310_v0 = vld [vmem:[%s356_s0] sm:$0xff]  ;;  %261 = vset.pattern.permute.xlu0 %v281_v7  ;;  %s282_s0 = smov 127   ;;  %vm70_vm4 = vcmask 7168   ;;  %vm221_vm5 = vcmask 1040384  }
   0x2   :  { %v147_v1 = vsel %vm146_vm0, %v310_v0, -inf  ;;  %v27_v2 = vmul.f32 1.442695, %v310_v0  ;;  %v317_v4 = vld [vmem:[%s357_s1] sm:$0xff]  ;;  %v241_v8 = vmul.f32 -1.442695, %v310_v0 }
   0x3   :  { %148 = vmax.xlane.f32.xlu1 %v147_v1  ;;  %v36_v6 = vmul.f32 0.5, %v317_v4  ;;  %s283_s1 = smov 123   ;;  %v248_v27 = vtrunc.f32 %v317_v4  ;;  %v333_v46 = vand.u32 127, %v131_v44  ;;  %v190_v56 = vld [vmem:[%s358_s2] sm:$0xff]  ;;  %s286_s2 = smov 124  }
   0x4   :  { %262 = vpow2.f32 %v27_v2  ;;  %v192_v57 = vand.u32 2147483647, %v190_v56 }
   0x5   :  { %264 = vpow2.f32 %v241_v8  ;;  %v249_v29 = vcvt.f32.s32 %v248_v27  ;;  %vm177_vm6 = vcmp.eq.s32.totalorder %v333_v46, 0  ;;  %vm180_vm7 = vcmp.eq.s32.totalorder %v333_v46, 1 }
   0x6   :  { %v193_v58 = vsub.f32 0.0, %v192_v57  ;;  %vm183_vm8 = vcmp.eq.s32.totalorder %v333_v46, 2  ;;  %vm186_vm9 = vcmp.eq.s32.totalorder %v333_v46, 3  ;;  %vm232_vm10 = vcmp.eq.s32.totalorder %v333_v46, 4 }
   0x8   :  { %v194_v59 = vmul.f32 1.442695, %v193_v58 }
   0xe   :  { %v263_v3 = vpop.eup %262 }
   0xf   :  { %v29_v5 = vmul.f32 0.5, %v263_v3  ;;  %v265_v9 = vpop.eup %264 }
  0x10   :  { %v24_v10 = vadd.f32 1.0, %v265_v9 }
  0x11   :  { %31 = vrot.lane.b32.xlu0 %v29_v5, %s280_s16  ;;  %v191_v5 = vmax.f32 %v190_v56, 0.0 }
  0x12   :  { %266 = vrcp.f32 %v24_v10  ;;  %v285_v10 = vmov 0.0  }
  0x13   :  { %18 = vst [vmem:[#allocation3] sm:$0x1] %v285_v10 }
  0x15   :  { %38 = vrot.lane.b32.xlu0 %v36_v6, %s280_s16 }
  0x1c   :  { %v267_v11 = vpop.eup %266 }
  0x83   :  { %v32_v12 = vpop.permute.xlu0 %31 }
  0x84   :  { %v34_v13 = vsub.f32 %v267_v11, %v32_v12  ;;  %v35_v14 = vadd.f32 %v267_v11, %v32_v12 }
  0x86   :  { %v52_v15 = vsub.f32 %v35_v14, %v34_v13 }
  0x87   :  { %v39_v16 = vpop.permute.xlu0 %38 }
  0x88   :  { %v41_v17 = vsub.f32 %v317_v4, %v39_v16  ;;  %v42_v18 = vadd.f32 %v39_v16, %v317_v4  ;;  %55 = vrot.lane.b32.xlu1 %v52_v15, %s282_s0 }
  0x8a   :  { %v43_v19 = vmin.f32 %v35_v14, %v42_v18  ;;  %v44_v20 = vmax.f32 %v34_v13, %v41_v17  ;;  %v53_v21 = vsub.f32 %v42_v18, %v41_v17 }
  0x8c   :  { %61 = vrot.lane.b32.xlu0 %v53_v21, %s282_s0  ;;  %v45_v22 = vsub.f32 %v43_v19, %v44_v20  ;;  %85 = vrot.lane.b32.xlu1 %v317_v4, %s282_s0 }
  0x8e   :  { %v46_v23 = vmax.f32 %v45_v22, 0.0 }
  0x90   :  { %v326_v24 = vpop.xlane.xlu1 %148  ;;  %48 = vrot.lane.b32.xlu0 %v46_v23, %s282_s0  ;;  %138 = vrot.lane.b32.xlu1 %v310_v0, %s283_s1 }
  0x91   :  { %v150_v25 = vsub.f32 %v310_v0, %v326_v24 }
  0x93   :  { %v151_v26 = vmul.f32 1.442695, %v150_v25 }
  0x95   :  { %268 = vpow2.f32 %v151_v26 }
  0x9f   :  { %v269_v28 = vpop.eup %268 }
  0xa0   :  { %154 = vrot.lane.b32.xlu0 %v269_v28, %s283_s1 }
  0xa4   :  { %134 = vperm.xlu0 %261, %v249_v29  }
  0xfa   :  { %v56_v30 = vpop.permute.xlu1 %55 }
  0xfb   :  { %v58_v31 = vmul.f32 %v56_v30, %v52_v15  ;;  %v206_v15 = vld [vmem:[#allocation3] sm:$0x1] }
  0xfd   :  { %v59_v34 = vadd.f32 1e-16, %v58_v31 }
  0xfe   :  { %v62_v32 = vpop.permute.xlu0 %61  ;;  %v86_v45 = vpop.permute.xlu1 %85 }
  0xff   :  { %v64_v33 = vmul.f32 %v62_v32, %v53_v21  ;;  %v88_v49 = vmul.f32 %v86_v45, %v317_v4 }
 0x101   :  { %v65_v36 = vadd.f32 %v64_v33, %v59_v34  ;;  %v89_v51 = vsub.f32 0.0, %v88_v49 }
 0x102   :  { %v49_v35 = vpop.permute.xlu0 %48  ;;  %v139_v48 = vpop.permute.xlu1 %138 }
 0x103   :  { %v51_v37 = vmul.f32 %v49_v35, %v46_v23  ;;  %v90_v53 = vmul.f32 2.0, %v89_v51 }
 0x105   :  { %v66_v38 = vsub.f32 %v65_v36, %v51_v37  ;;  %v91_v54 = vmul.f32 1.442695, %v90_v53 }
 0x107   :  { %270 = vrcp.f32 %v66_v38 }
 0x108   :  { %272 = vpow2.f32 %v91_v54 }
 0x109   :  { %274 = vpow2.f32 %v194_v59 }
 0x111   :  { %v271_v39 = vpop.eup %270 }
 0x112   :  { %v68_v40 = vmul.f32 %v271_v39, %v51_v37  ;;  %v155_v41 = vpop.permute.xlu0 %154  ;;  %v273_v55 = vpop.eup %272 }
 0x113   :  { %v157_v42 = vsel %vm142_vm1, %v155_v41, 0.0  ;;  %v275_v60 = vpop.eup %274 }
 0x114   :  { %158 = vadd.xlane.f32.xlu1 %v157_v42  ;;  %v110_v43 = vmax.f32 %v68_v40, 0.0  ;;  %v196_v61 = vadd.f32 1.0, %v275_v60  ;;  %v199_v62 = vmul.f32 -0.5, %v275_v60  ;;  %v202_v2 = vand.u32 2147483647, %v275_v60 }
 0x115   :  { %v69_v19 = vsub.f32 1.0, %v68_v40 }
 0x116   :  { %112 = vrot.lane.b32.xlu0 %v110_v43, %s284_s17  ;;  %276 = vlog2.f32 %v196_v61  ;;  %v200_v63 = vadd.f32 1.0, %v199_v62  ;;  %vm203_vm3 = vcmp.lt.f32.partialorder %v202_v2, 0.0004427343 }
 0x117   :  { %v71_v21 = vsel %vm70_vm4, %v69_v19, 0.0 }
 0x118   :  { %v201_v4 = vmul.f32 %v275_v60, %v200_v63 }
 0x120   :  { %v277_v1 = vpop.eup %276 }
 0x121   :  { %v198_v3 = vmul.f32 0.6931472, %v277_v1 }
 0x123   :  { %v135_v47 = vpop.permute.xlu0 %134  ;;  %v204_v6 = vsel %vm203_vm3, %v201_v4, %v198_v3 }
 0x124   :  { %vm136_vm2 = vcmp.eq.s32.totalorder %v333_v46, %v135_v47  ;;  %v205_v7 = vadd.f32 %v204_v6, %v191_v5 }
 0x125   :  { %v141_v50 = vsel %vm136_vm2, %v139_v48, 0.0 }
 0x126   :  { %v143_v52 = vsel %vm142_vm1, %v141_v50, 0.0  ;;  %v207_v8 = vrot.slane %v205_v7, 4 }
 0x128   :  { %v208_v9 = vadd.f32 %v207_v8, %v205_v7 }
 0x12a   :  { %v209_v11 = vrot.slane %v208_v9, 2 }
 0x12c   :  { %v210_v12 = vadd.f32 %v209_v11, %v208_v9 }
 0x12e   :  { %v211_v13 = vrot.slane %v210_v12, 1 }
 0x130   :  { %v212_v14 = vadd.f32 %v211_v13, %v210_v12 }
 0x132   :  { %v213_v16 = vadd.f32 %v212_v14, %v206_v15 }
 0x134   :  { %214 = vst [vmem:[#allocation3] sm:$0x1] %v213_v16 }
 0x135   :  { %144 = vadd.xlane.f32.xlu0 %v143_v52 }
 0x13b   :  { %v220_v31 = vld [vmem:[#allocation3] sm:$0x1] }
 0x13c   :  { %v222_v33 = vsel %vm221_vm5, %v220_v31, 0.0 }
 0x14b   :  { %94 = vrot.lane.b32.xlu0 %v273_v55, %s280_s16 }
 0x188   :  { %v113_v17 = vpop.permute.xlu0 %112 }
 0x189   :  { %v115_v18 = vmul.f32 %v113_v17, %v310_v0 }
 0x18b   :  { %117 = vrot.lane.b32.xlu1 %v115_v18, %s286_s2 }
 0x1a1   :  { %v159_v20 = vpop.xlane.xlu1 %158 }
 0x1a2   :  { %278 = vlog2.f32 %v159_v20 }
 0x1ac   :  { %v279_v22 = vpop.eup %278 }
 0x1ad   :  { %v161_v23 = vmul.f32 0.6931472, %v279_v22 }
 0x1af   :  { %72 = vadd.xlane.f32.xlu1 %v71_v21  ;;  %v162_v25 = vadd.f32 %v161_v23, %v326_v24 }
 0x1c2   :  { %v145_v26 = vpop.xlane.xlu0 %144 }
 0x1c3   :  { %v163_v27 = vsub.f32 %v162_v25, %v145_v26 }
 0x1c5   :  { %v164_v28 = vsel %vm70_vm4, %v163_v27, 0.0 }
 0x1c6   :  { %165 = vadd.xlane.f32.xlu1 %v164_v28  ;;  %v95_v29 = vpop.permute.xlu0 %94 }
 0x1c7   :  { %v97_v0 = vsel %vm70_vm4, %v95_v29, 0.0 }
 0x1c8   :  { %98 = vadd.xlane.f32.xlu0 %v97_v0 }
 0x1fd   :  { %v118_v30 = vpop.permute.xlu1 %117 }
 0x1fe   :  { %v120_v32 = vsel %vm70_vm4, %v118_v30, 0.0 }
 0x1ff   :  { %121 = vadd.xlane.f32.xlu0 %v120_v32 }
 0x203   :  { %223 = vadd.xlane.f32.xlu0 %v222_v33 }
 0x23c   :  { %v73_v34 = vpop.xlane.xlu1 %72 }
 0x23d   :  { %v74_v35 = vrot.slane %v73_v34, 4 }
 0x23f   :  { %v75_v24 = vadd.f32 %v74_v35, %v73_v34 }
 0x241   :  { %v76_v36 = vrot.slane %v75_v24, 2 }
 0x243   :  { %v77_v37 = vadd.f32 %v76_v36, %v75_v24 }
 0x245   :  { %v78_v38 = vrot.slane %v77_v37, 1 }
 0x247   :  { %v79_v39 = vadd.f32 %v78_v38, %v77_v37 }
 0x249   :  { %242 = vpush %v79_v39 }
 0x253   :  { %v166_v48 = vpop.xlane.xlu1 %165 }
 0x254   :  { %v167_v49 = vrot.slane %v166_v48, 4 }
 0x255   :  { %v99_v40 = vpop.xlane.xlu0 %98 }
 0x256   :  { %v100_v41 = vrot.slane %v99_v40, 4  ;;  %v168_v50 = vadd.f32 %v167_v49, %v166_v48 }
 0x258   :  { %v101_v42 = vadd.f32 %v100_v41, %v99_v40  ;;  %v169_v51 = vrot.slane %v168_v50, 2 }
 0x25a   :  { %v102_v43 = vrot.slane %v101_v42, 2  ;;  %v170_v55 = vadd.f32 %v169_v51, %v168_v50 }
 0x25c   :  { %v103_v44 = vadd.f32 %v102_v43, %v101_v42  ;;  %v171_v61 = vrot.slane %v170_v55, 1 }
 0x25e   :  { %v104_v45 = vrot.slane %v103_v44, 1  ;;  %v172_v3 = vadd.f32 %v171_v61, %v170_v55 }
 0x260   :  { %v105_v47 = vadd.f32 %v104_v45, %v103_v44 }
 0x262   :  { %244 = vpush %v105_v47 }
 0x27a   :  { %s243_s20 = spop %242 }
 0x27b   :  { %s83_s22 = smul.f32 0.125, %s243_s20 }
 0x27d   :  { %v178_v6 = vstv %s83_s22 }
 0x27e   :  { %v179_v8 = vsel %vm177_vm6, %v178_v6, 0.0 }
 0x28c   :  { %v122_v52 = vpop.xlane.xlu0 %121 }
 0x28d   :  { %v123_v53 = vrot.slane %v122_v52, 4 }
 0x28f   :  { %v124_v54 = vadd.f32 %v123_v53, %v122_v52 }
 0x290   :  { %v224_v56 = vpop.xlane.xlu0 %223 }
 0x291   :  { %v125_v57 = vrot.slane %v124_v54, 2  ;;  %v225_v58 = vrot.slane %v224_v56, 4 }
 0x293   :  { %v226_v59 = vadd.f32 %v225_v58, %v224_v56  ;;  %v126_v60 = vadd.f32 %v125_v57, %v124_v54  ;;  %s245_s21 = spop %244 }
 0x294   :  { %s109_s23 = smul.f32 0.125, %s245_s21 }
 0x295   :  { %v227_v62 = vrot.slane %v226_v59, 2  ;;  %v127_v63 = vrot.slane %v126_v60, 1 }
 0x296   :  { %v181_v7 = vstv %s109_s23 }
 0x297   :  { %v228_v1 = vadd.f32 %v227_v62, %v226_v59  ;;  %v128_v2 = vadd.f32 %v127_v63, %v126_v60  ;;  %v182_v9 = vsel %vm180_vm7, %v181_v7, %v179_v8 }
 0x299   :  { %246 = vpush %v128_v2  ;;  %v229_v4 = vrot.slane %v228_v1, 1 }
 0x29a   :  { %250 = vpush %v172_v3 }
 0x29b   :  { %v230_v5 = vadd.f32 %v229_v4, %v228_v1 }
 0x29d   :  { %252 = vpush %v230_v5 }
 0x2ca   :  { %s247_s24 = spop %246 }
 0x2cb   :  { %s251_s25 = spop %250  ;;  %v187_v11 = vstv %s247_s24 }
 0x2cc   :  { %s176_s26 = smul.f32 0.125, %s251_s25 }
 0x2ce   :  { %v184_v10 = vstv %s176_s26  ;;  %s253_s27 = spop %252 }
 0x2cf   :  { %v185_v12 = vsel %vm183_vm8, %v184_v10, %v182_v9  ;;  %v234_v15 = vstv %s253_s27 }
 0x2d0   :  { %v188_v13 = vsel %vm186_vm9, %v187_v11, %v185_v12 }
 0x2d1   :  { %189 = vst [vmem:[#allocation2] sm:$0x1] %v188_v13 }
 0x2d8   :  { %v233_v14 = vld [vmem:[#allocation2] sm:$0x1] }
 0x2d9   :  { %v235_v16 = vsel %vm232_vm10, %v234_v15, %v233_v14 }
 0x2da   :  { %236 = vst [vmem:[%s359_s3] sm:$0x1] %v235_v16 }

</bundles_post_ra>
